<compile_context>
chip_gen: v7x
topology: tpu7x:2x2x1
jax: 0.10.0
libtpu: 0.0.40
codegen_flags: <defaults>
</compile_context>

<pallas_src>
import numpy as np
import jax
import jax.numpy as jnp
from jax import lax
from jax.experimental import pallas as pl
from jax.experimental.pallas import tpu as pltpu


# ---------------------------------------------------------------------------
# Bilinear ConvTranspose2d (fill_up_weights) folded into a constant matrix
# ---------------------------------------------------------------------------
def _bilinear_1d(f):
    c = (2 * f - 1 - f % 2) / (2.0 * f)
    i = np.arange(2 * f, dtype=np.float64)
    return 1.0 - np.abs(i / f - c)


def _up_matrix_1d(in_size, f):
    """U[o, i] s.t. out = U @ x == ConvTranspose1d(kernel=2f, stride=f,
    padding=f//2, output_padding=0) with bilinear (fill_up_weights) weights."""
    w = _bilinear_1d(f)
    pad = f // 2
    out_size = (in_size - 1) * f - 2 * pad + 2 * f
    U = np.zeros((out_size, in_size), np.float64)
    for o in range(out_size):
        for i in range(in_size):
            k = o + pad - f * i
            if 0 <= k < 2 * f:
                U[o, i] = w[k]
    return U


def _up_matrix_2d(h, w, f):
    """kron(Uy, Ux): (Ho*Wo, H*W) matrix implementing the separable depthwise
    bilinear ConvTranspose2d on row-major flattened spatial axes (exact)."""
    Uy = _up_matrix_1d(h, f)
    Ux = _up_matrix_1d(w, f)
    return np.kron(Uy, Ux).astype(np.float32), Uy.shape[0], Ux.shape[0]


# ---------------------------------------------------------------------------
# Fused IDAUp kernel (built per static configuration)
# ---------------------------------------------------------------------------
def _build_kernel(plan):
    L = plan["num_levels"]
    K = plan["node_kernel"]
    Cout = plan["out_dim"]
    Ho, Wo = plan["out_hw"]
    HW = Ho * Wo
    lv = plan["levels"]            # per level: {"hw", "cin", "proj", "up"}
    md = plan["matmul_dtype"]
    pad = K // 2

    def kernel(*refs):
        it = iter(refs)
        layer_refs = [next(it) for _ in range(L)]
        proj_refs, up_refs = {}, {}
        for i in range(L):
            if lv[i]["proj"]:
                proj_refs[i] = (next(it), next(it))      # wT (Cout,Ci), b (Cout,1)
            if lv[i]["up"]:
                up_refs[i] = next(it)                    # B^T (Hi*Wi, Ho*Wo), f32
        node_refs = [(next(it), next(it)) for _ in range(L - 1)]  # wT (Cout, 2*K*K*Cout), b
        out_refs = [next(it) for _ in range(max(L - 1, 1))]

        def process_level(i):
            # Lane-dense (Ci, Hi*Wi) block; no in-kernel reshape needed.  [#1]
            x = layer_refs[i][0]
            if lv[i]["proj"]:                            # 1x1 conv + bias + ReLU
                wT, b = proj_refs[i]
                z = jnp.dot(wT[...], x.astype(md),
                            preferred_element_type=jnp.float32)
                x = jnp.maximum(z + b[...], 0.0)
            if lv[i]["up"]:                              # exact bilinear up-sample (f32)
                x = jnp.dot(x.astype(jnp.float32), up_refs[i][...],
                            preferred_element_type=jnp.float32)
            return x.astype(jnp.float32)                 # (Cout, Ho*Wo)

        x = process_level(0)

        if L == 1:                                       # degenerate: no nodes
            out_refs[0][0] = x.astype(out_refs[0].dtype)
            return

        # --- KxK tap shifts + boundary masks, hoisted once per invocation [#2]
        taps = []                                        # (lane_shift, mask-or-None)
        if K > 1:
            col = lax.broadcasted_iota(jnp.int32, (Cout, HW), 1)
            if Wo & (Wo - 1) == 0:                       # fast path: W power of 2
                ww = jnp.bitwise_and(col, Wo - 1)
            else:
                ww = lax.rem(col, Wo)
            for ky in range(K):
                for kx in range(K):
                    dy, dx = ky - pad, kx - pad
                    conds = []
                    if dy > 0:
                        conds.append(col < HW - dy * Wo)
                    if dy < 0:
                        conds.append(col >= -dy * Wo)
                    if dx > 0:
                        conds.append(ww < Wo - dx)
                    if dx < 0:
                        conds.append(ww >= -dx)
                    m = None
                    for c in conds:
                        m = c if m is None else (m & c)
                    taps.append(((-(dy * Wo + dx)) % HW, m))

        def tap_blocks(t):                               # t: (Cout, HW) f32
            if K == 1:
                return [t]
            blocks = []
            for shift, m in taps:
                s = pltpu.roll(t, shift=shift, axis=1) if shift else t
                blocks.append(s if m is None else jnp.where(m, s, 0.0))
            return blocks

        for i in range(1, L):
            l = process_level(i)
            wT, b = node_refs[i - 1]
            # One fused matmul over both halves of cat([x, l], C).         [#3]
            patches = jnp.concatenate(tap_blocks(x) + tap_blocks(l), axis=0)
            acc = jnp.dot(wT[...], patches.astype(md),
                          preferred_element_type=jnp.float32)
            acc = jnp.maximum(acc + b[...], 0.0)         # bias + ReLU in f32
            out_refs[i - 1][0] = acc.astype(out_refs[i - 1].dtype)  # lane-dense store
            x = acc                                      # chain in f32 (matches torch)

    return kernel


# ---------------------------------------------------------------------------
# Parameters (conv weights ~ N(0, 0.02), small random bias) + one-time prep
# ---------------------------------------------------------------------------
def init_ida_up_params(key, channels, up_factors, out_dim, node_kernel):
    params = {"proj": {}, "node": {}}
    L = len(channels)
    keys = jax.random.split(key, 4 * L)
    for i, c in enumerate(channels):
        if c != out_dim:
            w = 0.02 * jax.random.normal(keys[4 * i], (1, 1, c, out_dim), jnp.float32)
            b = 0.05 * jax.random.normal(keys[4 * i + 1], (out_dim,), jnp.float32)
            params["proj"][i] = (w, b)
    for i in range(1, L):
        w = 0.02 * jax.random.normal(
            keys[4 * i + 2], (node_kernel, node_kernel, 2 * out_dim, out_dim),
            jnp.float32)
        b = 0.05 * jax.random.normal(keys[4 * i + 3], (out_dim,), jnp.float32)
        params["node"][i] = (w, b)
    return params


def prepare_ida_up(params, channels, up_factors, out_dim, node_kernel, spatials,
                   matmul_dtype=jnp.bfloat16, out_dtype=jnp.float32):
    """One-time weight re-layout (outside the hot path):
       * proj weight -> (Cout, Cin) transposed, matmul dtype
       * bilinear ConvTranspose2d -> constant kron(Uy, Ux)^T (kept f32, exact)
       * node weight -> single fused (Cout, 2*K*K*Cout) matrix (x-half | l-half)"""
    L = len(channels)
    K = node_kernel
    levels, out_hw = [], None
    consts = {"proj": {}, "up": {}, "node": {}}

    for i, c in enumerate(channels):
        H, W = spatials[i]
        f = int(up_factors[i])
        has_proj = c != out_dim
        has_up = f > 1
        if has_up:
            B, Ho, Wo = _up_matrix_2d(H, W, f)           # exact ConvTranspose2d
            consts["up"][i] = jnp.asarray(B.T, jnp.float32)
            hw_i = (Ho, Wo)
        else:
            hw_i = (H, W)
        if out_hw is None:
            out_hw = hw_i
        assert hw_i == out_hw, "all levels must up-sample to the same spatial size"
        if has_proj:
            w, b = params["proj"][i]
            consts["proj"][i] = (
                jnp.asarray(jnp.reshape(w, (c, out_dim)).T, matmul_dtype),
                jnp.asarray(jnp.reshape(b, (out_dim, 1)), jnp.float32))
        else:
            assert c == out_dim
        levels.append({"hw": (H, W), "cin": c, "proj": has_proj, "up": has_up})

    for i in range(1, L):
        w, b = params["node"][i]                         # (K, K, 2*Cout, Cout)
        w_x = jnp.reshape(w[:, :, :out_dim, :], (K * K * out_dim, out_dim))
        w_l = jnp.reshape(w[:, :, out_dim:, :], (K * K * out_dim, out_dim))
        w_cat = jnp.concatenate([w_x, w_l], axis=0).T    # (Cout, 2*K*K*Cout)
        consts["node"][i] = (jnp.asarray(w_cat, matmul_dtype),
                             jnp.asarray(jnp.reshape(b, (out_dim, 1)), jnp.float32))

    plan = {"num_levels": L, "node_kernel": K, "out_dim": out_dim,
            "out_hw": out_hw, "levels": levels,
            "matmul_dtype": matmul_dtype, "out_dtype": out_dtype}
    return plan, consts


# ---------------------------------------------------------------------------
# Forward: a single pallas_call; inputs / outputs are NCHW (matches PyTorch)
# ---------------------------------------------------------------------------
def ida_up_forward(layers_nchw, plan, consts):
    L = plan["num_levels"]
    Cout = plan["out_dim"]
    Ho, Wo = plan["out_hw"]
    HW = Ho * Wo
    lv = plan["levels"]
    N = layers_nchw[0].shape[0]
    assert len(layers_nchw) == L

    args, in_specs = [], []
    for i in range(L):
        H, W = lv[i]["hw"]
        C = lv[i]["cin"]
        assert layers_nchw[i].shape == (N, C, H, W)
        args.append(layers_nchw[i].reshape(N, C, H * W))      # free reshape [#1]
        in_specs.append(pl.BlockSpec((1, C, H * W), lambda n: (n, 0, 0)))
    # Constant operands: full-array blocks with constant index_map (fetched once).
    for i in range(L):
        if lv[i]["proj"]:
            wT, b = consts["proj"][i]
            args += [wT, b]
            in_specs += [pl.BlockSpec(wT.shape, lambda n: (0, 0)),
                         pl.BlockSpec(b.shape, lambda n: (0, 0))]
        if lv[i]["up"]:
            bt = consts["up"][i]
            args.append(bt)
            in_specs.append(pl.BlockSpec(bt.shape, lambda n: (0, 0)))
    for i in range(1, L):
        wT, b = consts["node"][i]
        args += [wT, b]
        in_specs += [pl.BlockSpec(wT.shape, lambda n: (0, 0)),
                     pl.BlockSpec(b.shape, lambda n: (0, 0))]

    n_out = max(L - 1, 1)
    out_shape = [jax.ShapeDtypeStruct((N, Cout, HW), plan["out_dtype"])] * n_out
    out_specs = [pl.BlockSpec((1, Cout, HW), lambda n: (n, 0, 0))] * n_out

    outs = pl.pallas_call(
        _build_kernel(plan),
        grid=(N,),
        in_specs=in_specs,
        out_specs=out_specs,
        out_shape=out_shape,
        compiler_params=pltpu.CompilerParams(
            dimension_semantics=("parallel",),       # megacore-shard over batch
            vmem_limit_bytes=32 * 1024 * 1024),      # explicit VMEM budget [#7]
    )(*args)
    if not isinstance(outs, (list, tuple)):
        outs = [outs]

    # (N, Cout, Ho*Wo) -> (N, Cout, Ho, Wo): contiguous reshape, no transpose.
    y = [o.reshape(N, Cout, Ho, Wo) for o in outs]
    if L == 1:
        return y[0], []
    return y[-1], list(y)


# ---------------------------------------------------------------------------
# Pure-numpy reference (faithful to the PyTorch module) for validation
# ---------------------------------------------------------------------------
def _np_conv_transpose_bilinear(x, f):
    N, C, H, W = x.shape
    k = 2 * f
    pad = f // 2
    w1 = _bilinear_1d(f)
    w2 = np.outer(w1, w1)                                  # == fill_up_weights
    Hb, Wb = (H - 1) * f + k, (W - 1) * f + k
    big = np.zeros((N, C, Hb, Wb), x.dtype)
    for ky in range(k):
        for kx in range(k):
            big[:, :, ky:ky + (H - 1) * f + 1:f,
                      kx:kx + (W - 1) * f + 1:f] += w2[ky, kx] * x
    return big[:, :, pad:Hb - pad, pad:Wb - pad]


def _np_conv2d(x, w, b, pad):
    N, Cin, H, W = x.shape
    K = w.shape[0]
    xp = np.pad(x, ((0, 0), (0, 0), (pad, pad), (pad, pad)))
    out = np.zeros((N, w.shape[3], H, W), x.dtype)
    for ky in range(K):
        for kx in range(K):
            out += np.einsum('nchw,co->nohw', xp[:, :, ky:ky + H, kx:kx + W], w[ky, kx])
    return out + b[None, :, None, None]


def ida_up_reference_np(layers, params, channels, up_factors, out_dim, K):
    L = len(channels)
    feats = []
    for i in range(L):
        x = np.asarray(layers[i], np.float64)
        if channels[i] != out_dim:
            w, b = params["proj"][i]
            x = np.einsum('nchw,co->nohw', x, np.asarray(w, np.float64)[0, 0])
            x = np.maximum(x + np.asarray(b, np.float64)[None, :, None, None], 0.0)
        f = int(up_factors[i])
        if f > 1:
            x = _np_conv_transpose_bilinear(x, f)
        feats.append(x)
    x = feats[0]
    ys = []
    for i in range(1, L):
        w, b = params["node"][i]
        cat = np.concatenate([x, feats[i]], axis=1)
        x = np.maximum(_np_conv2d(cat, np.asarray(w, np.float64),
                                  np.asarray(b, np.float64), K // 2), 0.0)
        ys.append(x)
    return x, ys


# ---------------------------------------------------------------------------
# Demo
# ---------------------------------------------------------------------------
if __name__ == "__main__":
    key = jax.random.PRNGKey(0)

    node_kernel = 3
    out_dim = 16
    channels = [16, 24, 32]
    up_factors = [1, 2, 4]
    N, H0, W0 = 2, 16, 16
    spatials = [(H0 // f, W0 // f) for f in up_factors]

    k_in, k_par = jax.random.split(key)
    in_keys = jax.random.split(k_in, len(channels))
    layers_nchw = [
        jax.random.normal(in_keys[i],
                          (N, channels[i], spatials[i][0], spatials[i][1]),
                          jnp.float32)
        for i in range(len(channels))
    ]

    params = init_ida_up_params(k_par, channels, up_factors, out_dim, node_kernel)
    plan, consts = prepare_ida_up(params, channels, up_factors, out_dim,
                                  node_kernel, spatials,
                                  matmul_dtype=jnp.bfloat16,
                                  out_dtype=jnp.float32)

    fwd = jax.jit(lambda *ls: ida_up_forward(list(ls), plan, consts))
    x_out, y_out = fwd(*layers_nchw)
    x_out = jax.block_until_ready(x_out)
    for t in y_out:
        jax.block_until_ready(t)

    assert x_out.shape == (N, out_dim, H0, W0), x_out.shape
    assert len(y_out) == len(channels) - 1
    for t in y_out:
        assert t.shape == (N, out_dim, H0, W0), t.shape

    # Validate against a pure-numpy reference of the PyTorch forward
    # (bf16 conv matmuls inside the kernel -> loose tolerance).
    ref_x, ref_y = ida_up_reference_np(layers_nchw, params, channels,
                                       up_factors, out_dim, node_kernel)
    np.testing.assert_allclose(np.asarray(x_out), ref_x, rtol=5e-2, atol=2e-2)
    for yo, yr in zip(y_out, ref_y):
        np.testing.assert_allclose(np.asarray(yo), yr, rtol=5e-2, atol=2e-2)

    print("KERNEL_OK")
</pallas_src>

<mosaic_0001>
module attributes {stable_mosaic.version = 11 : i64} {
  func.func @kernel(%arg0: i32, %arg1: memref<1x16x256xf32, #tpu.memory_space<vmem>>, %arg2: memref<1x24x64xf32, #tpu.memory_space<vmem>>, %arg3: memref<1x32x16xf32, #tpu.memory_space<vmem>>, %arg4: memref<16x24xbf16, #tpu.memory_space<vmem>>, %arg5: memref<16x1xf32, #tpu.memory_space<vmem>>, %arg6: memref<64x256xf32, #tpu.memory_space<vmem>>, %arg7: memref<16x32xbf16, #tpu.memory_space<vmem>>, %arg8: memref<16x1xf32, #tpu.memory_space<vmem>>, %arg9: memref<16x256xf32, #tpu.memory_space<vmem>>, %arg10: memref<16x288xbf16, #tpu.memory_space<vmem>>, %arg11: memref<16x1xf32, #tpu.memory_space<vmem>>, %arg12: memref<16x288xbf16, #tpu.memory_space<vmem>>, %arg13: memref<16x1xf32, #tpu.memory_space<vmem>>, %arg14: memref<1x16x256xf32, #tpu.memory_space<vmem>>, %arg15: memref<1x16x256xf32, #tpu.memory_space<vmem>>) attributes {dimension_semantics = [#tpu.dimension_semantics<parallel>], iteration_bounds = array<i64: 2>, scalar_prefetch = 0 : i64, scratch_operands = 0 : i64, tpu.core_type = #tpu.core_type<tc>, window_params = [{transform_indices = @transform_0, window_bounds = array<i64: 1, 16, 256>}, {transform_indices = @transform_1, window_bounds = array<i64: 1, 24, 64>}, {transform_indices = @transform_2, window_bounds = array<i64: 1, 32, 16>}, {pipeline_mode = #tpu.pipeline_mode<synchronous>, transform_indices = @transform_3, window_bounds = array<i64: 16, 24>}, {pipeline_mode = #tpu.pipeline_mode<synchronous>, transform_indices = @transform_4, window_bounds = array<i64: 16, 1>}, {pipeline_mode = #tpu.pipeline_mode<synchronous>, transform_indices = @transform_5, window_bounds = array<i64: 64, 256>}, {pipeline_mode = #tpu.pipeline_mode<synchronous>, transform_indices = @transform_6, window_bounds = array<i64: 16, 32>}, {pipeline_mode = #tpu.pipeline_mode<synchronous>, transform_indices = @transform_7, window_bounds = array<i64: 16, 1>}, {pipeline_mode = #tpu.pipeline_mode<synchronous>, transform_indices = @transform_8, window_bounds = array<i64: 16, 256>}, {pipeline_mode = #tpu.pipeline_mode<synchronous>, transform_indices = @transform_9, window_bounds = array<i64: 16, 288>}, {pipeline_mode = #tpu.pipeline_mode<synchronous>, transform_indices = @transform_10, window_bounds = array<i64: 16, 1>}, {pipeline_mode = #tpu.pipeline_mode<synchronous>, transform_indices = @transform_11, window_bounds = array<i64: 16, 288>}, {pipeline_mode = #tpu.pipeline_mode<synchronous>, transform_indices = @transform_12, window_bounds = array<i64: 16, 1>}, {transform_indices = @transform_13, window_bounds = array<i64: 1, 16, 256>}, {transform_indices = @transform_14, window_bounds = array<i64: 1, 16, 256>}]} {
    %c0 = arith.constant 0 : index
    %c0_0 = arith.constant 0 : index
    %c0_1 = arith.constant 0 : index
    %0 = vector.load %arg1[%c0, %c0_0, %c0_1] : memref<1x16x256xf32, #tpu.memory_space<vmem>>, vector<1x16x256xf32>
    %1 = vector.shape_cast %0 : vector<1x16x256xf32> to vector<16x256xf32>
    %2 = tpu.iota {dimensions = array<i32: 1>} : vector<16x256xi32>
    %c15_i32 = arith.constant 15 : i32
    %3 = vector.broadcast %c15_i32 : i32 to vector<16x256xi32>
    %4 = arith.andi %2, %3 : vector<16x256xi32>
    %c16_i32 = arith.constant 16 : i32
    %5 = vector.broadcast %c16_i32 : i32 to vector<16x256xi32>
    %6 = arith.cmpi sge, %2, %5 : vector<16x256xi32>
    %c1_i32 = arith.constant 1 : i32
    %7 = vector.broadcast %c1_i32 : i32 to vector<16x256xi32>
    %8 = arith.cmpi sge, %4, %7 : vector<16x256xi32>
    %9 = arith.andi %6, %8 : vector<16x256xi1>
    %c16_i32_2 = arith.constant 16 : i32
    %10 = vector.broadcast %c16_i32_2 : i32 to vector<16x256xi32>
    %11 = arith.cmpi sge, %2, %10 : vector<16x256xi32>
    %c16_i32_3 = arith.constant 16 : i32
    %12 = vector.broadcast %c16_i32_3 : i32 to vector<16x256xi32>
    %13 = arith.cmpi sge, %2, %12 : vector<16x256xi32>
    %c15_i32_4 = arith.constant 15 : i32
    %14 = vector.broadcast %c15_i32_4 : i32 to vector<16x256xi32>
    %15 = arith.cmpi slt, %4, %14 : vector<16x256xi32>
    %16 = arith.andi %13, %15 : vector<16x256xi1>
    %c1_i32_5 = arith.constant 1 : i32
    %17 = vector.broadcast %c1_i32_5 : i32 to vector<16x256xi32>
    %18 = arith.cmpi sge, %4, %17 : vector<16x256xi32>
    %c15_i32_6 = arith.constant 15 : i32
    %19 = vector.broadcast %c15_i32_6 : i32 to vector<16x256xi32>
    %20 = arith.cmpi slt, %4, %19 : vector<16x256xi32>
    %c240_i32 = arith.constant 240 : i32
    %21 = vector.broadcast %c240_i32 : i32 to vector<16x256xi32>
    %22 = arith.cmpi slt, %2, %21 : vector<16x256xi32>
    %c1_i32_7 = arith.constant 1 : i32
    %23 = vector.broadcast %c1_i32_7 : i32 to vector<16x256xi32>
    %24 = arith.cmpi sge, %4, %23 : vector<16x256xi32>
    %25 = arith.andi %22, %24 : vector<16x256xi1>
    %c240_i32_8 = arith.constant 240 : i32
    %26 = vector.broadcast %c240_i32_8 : i32 to vector<16x256xi32>
    %27 = arith.cmpi slt, %2, %26 : vector<16x256xi32>
    %c240_i32_9 = arith.constant 240 : i32
    %28 = vector.broadcast %c240_i32_9 : i32 to vector<16x256xi32>
    %29 = arith.cmpi slt, %2, %28 : vector<16x256xi32>
    %c15_i32_10 = arith.constant 15 : i32
    %30 = vector.broadcast %c15_i32_10 : i32 to vector<16x256xi32>
    %31 = arith.cmpi slt, %4, %30 : vector<16x256xi32>
    %32 = arith.andi %29, %31 : vector<16x256xi1>
    %c0_11 = arith.constant 0 : index
    %c0_12 = arith.constant 0 : index
    %c0_13 = arith.constant 0 : index
    %33 = vector.load %arg2[%c0_11, %c0_12, %c0_13] : memref<1x24x64xf32, #tpu.memory_space<vmem>>, vector<1x24x64xf32>
    %34 = vector.shape_cast %33 : vector<1x24x64xf32> to vector<24x64xf32>
    %c0_14 = arith.constant 0 : index
    %c0_15 = arith.constant 0 : index
    %35 = vector.load %arg4[%c0_14, %c0_15] : memref<16x24xbf16, #tpu.memory_space<vmem>>, vector<16x24xbf16>
    %36 = arith.truncf %34 : vector<24x64xf32> to vector<24x64xbf16>
    %cst = arith.constant dense<0.000000e+00> : vector<16x64xf32>
    %37 = tpu.matmul %35, %36, %cst {dimension_numbers = #tpu.dot_dimension_numbers<[1], [0], [0], [1], [0, 0, 1, 1], [], []>} : vector<16x24xbf16>, vector<24x64xbf16>, vector<16x64xf32> -> vector<16x64xf32>
    %c0_16 = arith.constant 0 : index
    %c0_17 = arith.constant 0 : index
    %38 = vector.load %arg5[%c0_16, %c0_17] : memref<16x1xf32, #tpu.memory_space<vmem>>, vector<16x1xf32>
    %39 = vector.broadcast %38 : vector<16x1xf32> to vector<16x64xf32>
    %40 = arith.addf %37, %39 : vector<16x64xf32>
    %cst_18 = arith.constant 0.000000e+00 : f32
    %41 = vector.broadcast %cst_18 : f32 to vector<16x64xf32>
    %42 = arith.maximumf %40, %41 : vector<16x64xf32>
    %c0_19 = arith.constant 0 : index
    %c0_20 = arith.constant 0 : index
    %43 = vector.load %arg6[%c0_19, %c0_20] : memref<64x256xf32, #tpu.memory_space<vmem>>, vector<64x256xf32>
    %cst_21 = arith.constant dense<0.000000e+00> : vector<16x256xf32>
    %44 = tpu.matmul %42, %43, %cst_21 {dimension_numbers = #tpu.dot_dimension_numbers<[1], [0], [0], [1], [0, 0, 1, 1], [], []>} : vector<16x64xf32>, vector<64x256xf32>, vector<16x256xf32> -> vector<16x256xf32>
    %c17_i32 = arith.constant 17 : i32
    %45 = tpu.dynamic_rotate %1 by %c17_i32 dim 1 : vector<16x256xf32>, i32 -> vector<16x256xf32>
    %cst_22 = arith.constant 0.000000e+00 : f32
    %46 = vector.broadcast %cst_22 : f32 to vector<16x256xf32>
    %47 = arith.select %9, %45, %46 : vector<16x256xi1>, vector<16x256xf32>
    %c16_i32_23 = arith.constant 16 : i32
    %48 = tpu.dynamic_rotate %1 by %c16_i32_23 dim 1 : vector<16x256xf32>, i32 -> vector<16x256xf32>
    %cst_24 = arith.constant 0.000000e+00 : f32
    %49 = vector.broadcast %cst_24 : f32 to vector<16x256xf32>
    %50 = arith.select %11, %48, %49 : vector<16x256xi1>, vector<16x256xf32>
    %c15_i32_25 = arith.constant 15 : i32
    %51 = tpu.dynamic_rotate %1 by %c15_i32_25 dim 1 : vector<16x256xf32>, i32 -> vector<16x256xf32>
    %cst_26 = arith.constant 0.000000e+00 : f32
    %52 = vector.broadcast %cst_26 : f32 to vector<16x256xf32>
    %53 = arith.select %16, %51, %52 : vector<16x256xi1>, vector<16x256xf32>
    %c1_i32_27 = arith.constant 1 : i32
    %54 = tpu.dynamic_rotate %1 by %c1_i32_27 dim 1 : vector<16x256xf32>, i32 -> vector<16x256xf32>
    %cst_28 = arith.constant 0.000000e+00 : f32
    %55 = vector.broadcast %cst_28 : f32 to vector<16x256xf32>
    %56 = arith.select %18, %54, %55 : vector<16x256xi1>, vector<16x256xf32>
    %c255_i32 = arith.constant 255 : i32
    %57 = tpu.dynamic_rotate %1 by %c255_i32 dim 1 : vector<16x256xf32>, i32 -> vector<16x256xf32>
    %cst_29 = arith.constant 0.000000e+00 : f32
    %58 = vector.broadcast %cst_29 : f32 to vector<16x256xf32>
    %59 = arith.select %20, %57, %58 : vector<16x256xi1>, vector<16x256xf32>
    %c241_i32 = arith.constant 241 : i32
    %60 = tpu.dynamic_rotate %1 by %c241_i32 dim 1 : vector<16x256xf32>, i32 -> vector<16x256xf32>
    %cst_30 = arith.constant 0.000000e+00 : f32
    %61 = vector.broadcast %cst_30 : f32 to vector<16x256xf32>
    %62 = arith.select %25, %60, %61 : vector<16x256xi1>, vector<16x256xf32>
    %c240_i32_31 = arith.constant 240 : i32
    %63 = tpu.dynamic_rotate %1 by %c240_i32_31 dim 1 : vector<16x256xf32>, i32 -> vector<16x256xf32>
    %cst_32 = arith.constant 0.000000e+00 : f32
    %64 = vector.broadcast %cst_32 : f32 to vector<16x256xf32>
    %65 = arith.select %27, %63, %64 : vector<16x256xi1>, vector<16x256xf32>
    %c239_i32 = arith.constant 239 : i32
    %66 = tpu.dynamic_rotate %1 by %c239_i32 dim 1 : vector<16x256xf32>, i32 -> vector<16x256xf32>
    %cst_33 = arith.constant 0.000000e+00 : f32
    %67 = vector.broadcast %cst_33 : f32 to vector<16x256xf32>
    %68 = arith.select %32, %66, %67 : vector<16x256xi1>, vector<16x256xf32>
    %c17_i32_34 = arith.constant 17 : i32
    %69 = tpu.dynamic_rotate %44 by %c17_i32_34 dim 1 : vector<16x256xf32>, i32 -> vector<16x256xf32>
    %cst_35 = arith.constant 0.000000e+00 : f32
    %70 = vector.broadcast %cst_35 : f32 to vector<16x256xf32>
    %71 = arith.select %9, %69, %70 : vector<16x256xi1>, vector<16x256xf32>
    %c16_i32_36 = arith.constant 16 : i32
    %72 = tpu.dynamic_rotate %44 by %c16_i32_36 dim 1 : vector<16x256xf32>, i32 -> vector<16x256xf32>
    %cst_37 = arith.constant 0.000000e+00 : f32
    %73 = vector.broadcast %cst_37 : f32 to vector<16x256xf32>
    %74 = arith.select %11, %72, %73 : vector<16x256xi1>, vector<16x256xf32>
    %c15_i32_38 = arith.constant 15 : i32
    %75 = tpu.dynamic_rotate %44 by %c15_i32_38 dim 1 : vector<16x256xf32>, i32 -> vector<16x256xf32>
    %cst_39 = arith.constant 0.000000e+00 : f32
    %76 = vector.broadcast %cst_39 : f32 to vector<16x256xf32>
    %77 = arith.select %16, %75, %76 : vector<16x256xi1>, vector<16x256xf32>
    %c1_i32_40 = arith.constant 1 : i32
    %78 = tpu.dynamic_rotate %44 by %c1_i32_40 dim 1 : vector<16x256xf32>, i32 -> vector<16x256xf32>
    %cst_41 = arith.constant 0.000000e+00 : f32
    %79 = vector.broadcast %cst_41 : f32 to vector<16x256xf32>
    %80 = arith.select %18, %78, %79 : vector<16x256xi1>, vector<16x256xf32>
    %c255_i32_42 = arith.constant 255 : i32
    %81 = tpu.dynamic_rotate %44 by %c255_i32_42 dim 1 : vector<16x256xf32>, i32 -> vector<16x256xf32>
    %cst_43 = arith.constant 0.000000e+00 : f32
    %82 = vector.broadcast %cst_43 : f32 to vector<16x256xf32>
    %83 = arith.select %20, %81, %82 : vector<16x256xi1>, vector<16x256xf32>
    %c241_i32_44 = arith.constant 241 : i32
    %84 = tpu.dynamic_rotate %44 by %c241_i32_44 dim 1 : vector<16x256xf32>, i32 -> vector<16x256xf32>
    %cst_45 = arith.constant 0.000000e+00 : f32
    %85 = vector.broadcast %cst_45 : f32 to vector<16x256xf32>
    %86 = arith.select %25, %84, %85 : vector<16x256xi1>, vector<16x256xf32>
    %c240_i32_46 = arith.constant 240 : i32
    %87 = tpu.dynamic_rotate %44 by %c240_i32_46 dim 1 : vector<16x256xf32>, i32 -> vector<16x256xf32>
    %cst_47 = arith.constant 0.000000e+00 : f32
    %88 = vector.broadcast %cst_47 : f32 to vector<16x256xf32>
    %89 = arith.select %27, %87, %88 : vector<16x256xi1>, vector<16x256xf32>
    %c239_i32_48 = arith.constant 239 : i32
    %90 = tpu.dynamic_rotate %44 by %c239_i32_48 dim 1 : vector<16x256xf32>, i32 -> vector<16x256xf32>
    %cst_49 = arith.constant 0.000000e+00 : f32
    %91 = vector.broadcast %cst_49 : f32 to vector<16x256xf32>
    %92 = arith.select %32, %90, %91 : vector<16x256xi1>, vector<16x256xf32>
    %93 = tpu.concatenate %47, %50, %53, %56, %1, %59, %62, %65, %68, %71, %74, %77, %80, %44, %83, %86 in 0 : vector<16x256xf32>, vector<16x256xf32>, vector<16x256xf32>, vector<16x256xf32>, vector<16x256xf32>, vector<16x256xf32>, vector<16x256xf32>, vector<16x256xf32>, vector<16x256xf32>, vector<16x256xf32>, vector<16x256xf32>, vector<16x256xf32>, vector<16x256xf32>, vector<16x256xf32>, vector<16x256xf32>, vector<16x256xf32> -> vector<256x256xf32>
    %94 = tpu.concatenate %89, %92 in 0 : vector<16x256xf32>, vector<16x256xf32> -> vector<32x256xf32>
    %95 = tpu.concatenate %93, %94 in 0 : vector<256x256xf32>, vector<32x256xf32> -> vector<288x256xf32>
    %c0_50 = arith.constant 0 : index
    %c0_51 = arith.constant 0 : index
    %96 = vector.load %arg10[%c0_50, %c0_51] : memref<16x288xbf16, #tpu.memory_space<vmem>>, vector<16x288xbf16>
    %97 = arith.truncf %95 : vector<288x256xf32> to vector<288x256xbf16>
    %cst_52 = arith.constant dense<0.000000e+00> : vector<16x256xf32>
    %98 = tpu.matmul %96, %97, %cst_52 {dimension_numbers = #tpu.dot_dimension_numbers<[1], [0], [0], [1], [0, 0, 1, 1], [], []>} : vector<16x288xbf16>, vector<288x256xbf16>, vector<16x256xf32> -> vector<16x256xf32>
    %c0_53 = arith.constant 0 : index
    %c0_54 = arith.constant 0 : index
    %99 = vector.load %arg11[%c0_53, %c0_54] : memref<16x1xf32, #tpu.memory_space<vmem>>, vector<16x1xf32>
    %100 = vector.broadcast %99 : vector<16x1xf32> to vector<16x256xf32>
    %101 = arith.addf %98, %100 : vector<16x256xf32>
    %cst_55 = arith.constant 0.000000e+00 : f32
    %102 = vector.broadcast %cst_55 : f32 to vector<16x256xf32>
    %103 = arith.maximumf %101, %102 : vector<16x256xf32>
    %c0_56 = arith.constant 0 : index
    %c0_57 = arith.constant 0 : index
    %c0_58 = arith.constant 0 : index
    %104 = vector.load %arg14[%c0_56, %c0_57, %c0_58] : memref<1x16x256xf32, #tpu.memory_space<vmem>>, vector<1x16x256xf32>
    %105 = vector.shape_cast %104 : vector<1x16x256xf32> to vector<16x256xf32>
    %106 = vector.shape_cast %103 : vector<16x256xf32> to vector<1x16x256xf32>
    tpu.vector_store %arg14[%c0_56, %c0_57, %c0_58], %106 {strides = array<i32>} : memref<1x16x256xf32, #tpu.memory_space<vmem>>, vector<1x16x256xf32>,
    %c0_59 = arith.constant 0 : index
    %c0_60 = arith.constant 0 : index
    %c0_61 = arith.constant 0 : index
    %107 = vector.load %arg3[%c0_59, %c0_60, %c0_61] : memref<1x32x16xf32, #tpu.memory_space<vmem>>, vector<1x32x16xf32>
    %108 = vector.shape_cast %107 : vector<1x32x16xf32> to vector<32x16xf32>
    %c0_62 = arith.constant 0 : index
    %c0_63 = arith.constant 0 : index
    %109 = vector.load %arg7[%c0_62, %c0_63] : memref<16x32xbf16, #tpu.memory_space<vmem>>, vector<16x32xbf16>
    %110 = arith.truncf %108 : vector<32x16xf32> to vector<32x16xbf16>
    %cst_64 = arith.constant dense<0.000000e+00> : vector<16x16xf32>
    %111 = tpu.matmul %109, %110, %cst_64 {dimension_numbers = #tpu.dot_dimension_numbers<[1], [0], [0], [1], [0, 0, 1, 1], [], []>} : vector<16x32xbf16>, vector<32x16xbf16>, vector<16x16xf32> -> vector<16x16xf32>
    %c0_65 = arith.constant 0 : index
    %c0_66 = arith.constant 0 : index
    %112 = vector.load %arg8[%c0_65, %c0_66] : memref<16x1xf32, #tpu.memory_space<vmem>>, vector<16x1xf32>
    %113 = vector.broadcast %112 : vector<16x1xf32> to vector<16x16xf32>
    %114 = arith.addf %111, %113 : vector<16x16xf32>
    %cst_67 = arith.constant 0.000000e+00 : f32
    %115 = vector.broadcast %cst_67 : f32 to vector<16x16xf32>
    %116 = arith.maximumf %114, %115 : vector<16x16xf32>
    %c0_68 = arith.constant 0 : index
    %c0_69 = arith.constant 0 : index
    %117 = vector.load %arg9[%c0_68, %c0_69] : memref<16x256xf32, #tpu.memory_space<vmem>>, vector<16x256xf32>
    %cst_70 = arith.constant dense<0.000000e+00> : vector<16x256xf32>
    %118 = tpu.matmul %116, %117, %cst_70 {dimension_numbers = #tpu.dot_dimension_numbers<[1], [0], [0], [1], [0, 0, 1, 1], [], []>} : vector<16x16xf32>, vector<16x256xf32>, vector<16x256xf32> -> vector<16x256xf32>
    %c17_i32_71 = arith.constant 17 : i32
    %119 = tpu.dynamic_rotate %103 by %c17_i32_71 dim 1 : vector<16x256xf32>, i32 -> vector<16x256xf32>
    %cst_72 = arith.constant 0.000000e+00 : f32
    %120 = vector.broadcast %cst_72 : f32 to vector<16x256xf32>
    %121 = arith.select %9, %119, %120 : vector<16x256xi1>, vector<16x256xf32>
    %c16_i32_73 = arith.constant 16 : i32
    %122 = tpu.dynamic_rotate %103 by %c16_i32_73 dim 1 : vector<16x256xf32>, i32 -> vector<16x256xf32>
    %cst_74 = arith.constant 0.000000e+00 : f32
    %123 = vector.broadcast %cst_74 : f32 to vector<16x256xf32>
    %124 = arith.select %11, %122, %123 : vector<16x256xi1>, vector<16x256xf32>
    %c15_i32_75 = arith.constant 15 : i32
    %125 = tpu.dynamic_rotate %103 by %c15_i32_75 dim 1 : vector<16x256xf32>, i32 -> vector<16x256xf32>
    %cst_76 = arith.constant 0.000000e+00 : f32
    %126 = vector.broadcast %cst_76 : f32 to vector<16x256xf32>
    %127 = arith.select %16, %125, %126 : vector<16x256xi1>, vector<16x256xf32>
    %c1_i32_77 = arith.constant 1 : i32
    %128 = tpu.dynamic_rotate %103 by %c1_i32_77 dim 1 : vector<16x256xf32>, i32 -> vector<16x256xf32>
    %cst_78 = arith.constant 0.000000e+00 : f32
    %129 = vector.broadcast %cst_78 : f32 to vector<16x256xf32>
    %130 = arith.select %18, %128, %129 : vector<16x256xi1>, vector<16x256xf32>
    %c255_i32_79 = arith.constant 255 : i32
    %131 = tpu.dynamic_rotate %103 by %c255_i32_79 dim 1 : vector<16x256xf32>, i32 -> vector<16x256xf32>
    %cst_80 = arith.constant 0.000000e+00 : f32
    %132 = vector.broadcast %cst_80 : f32 to vector<16x256xf32>
    %133 = arith.select %20, %131, %132 : vector<16x256xi1>, vector<16x256xf32>
    %c241_i32_81 = arith.constant 241 : i32
    %134 = tpu.dynamic_rotate %103 by %c241_i32_81 dim 1 : vector<16x256xf32>, i32 -> vector<16x256xf32>
    %cst_82 = arith.constant 0.000000e+00 : f32
    %135 = vector.broadcast %cst_82 : f32 to vector<16x256xf32>
    %136 = arith.select %25, %134, %135 : vector<16x256xi1>, vector<16x256xf32>
    %c240_i32_83 = arith.constant 240 : i32
    %137 = tpu.dynamic_rotate %103 by %c240_i32_83 dim 1 : vector<16x256xf32>, i32 -> vector<16x256xf32>
    %cst_84 = arith.constant 0.000000e+00 : f32
    %138 = vector.broadcast %cst_84 : f32 to vector<16x256xf32>
    %139 = arith.select %27, %137, %138 : vector<16x256xi1>, vector<16x256xf32>
    %c239_i32_85 = arith.constant 239 : i32
    %140 = tpu.dynamic_rotate %103 by %c239_i32_85 dim 1 : vector<16x256xf32>, i32 -> vector<16x256xf32>
    %cst_86 = arith.constant 0.000000e+00 : f32
    %141 = vector.broadcast %cst_86 : f32 to vector<16x256xf32>
    %142 = arith.select %32, %140, %141 : vector<16x256xi1>, vector<16x256xf32>
    %c17_i32_87 = arith.constant 17 : i32
    %143 = tpu.dynamic_rotate %118 by %c17_i32_87 dim 1 : vector<16x256xf32>, i32 -> vector<16x256xf32>
    %cst_88 = arith.constant 0.000000e+00 : f32
    %144 = vector.broadcast %cst_88 : f32 to vector<16x256xf32>
    %145 = arith.select %9, %143, %144 : vector<16x256xi1>, vector<16x256xf32>
    %c16_i32_89 = arith.constant 16 : i32
    %146 = tpu.dynamic_rotate %118 by %c16_i32_89 dim 1 : vector<16x256xf32>, i32 -> vector<16x256xf32>
    %cst_90 = arith.constant 0.000000e+00 : f32
    %147 = vector.broadcast %cst_90 : f32 to vector<16x256xf32>
    %148 = arith.select %11, %146, %147 : vector<16x256xi1>, vector<16x256xf32>
    %c15_i32_91 = arith.constant 15 : i32
    %149 = tpu.dynamic_rotate %118 by %c15_i32_91 dim 1 : vector<16x256xf32>, i32 -> vector<16x256xf32>
    %cst_92 = arith.constant 0.000000e+00 : f32
    %150 = vector.broadcast %cst_92 : f32 to vector<16x256xf32>
    %151 = arith.select %16, %149, %150 : vector<16x256xi1>, vector<16x256xf32>
    %c1_i32_93 = arith.constant 1 : i32
    %152 = tpu.dynamic_rotate %118 by %c1_i32_93 dim 1 : vector<16x256xf32>, i32 -> vector<16x256xf32>
    %cst_94 = arith.constant 0.000000e+00 : f32
    %153 = vector.broadcast %cst_94 : f32 to vector<16x256xf32>
    %154 = arith.select %18, %152, %153 : vector<16x256xi1>, vector<16x256xf32>
    %c255_i32_95 = arith.constant 255 : i32
    %155 = tpu.dynamic_rotate %118 by %c255_i32_95 dim 1 : vector<16x256xf32>, i32 -> vector<16x256xf32>
    %cst_96 = arith.constant 0.000000e+00 : f32
    %156 = vector.broadcast %cst_96 : f32 to vector<16x256xf32>
    %157 = arith.select %20, %155, %156 : vector<16x256xi1>, vector<16x256xf32>
    %c241_i32_97 = arith.constant 241 : i32
    %158 = tpu.dynamic_rotate %118 by %c241_i32_97 dim 1 : vector<16x256xf32>, i32 -> vector<16x256xf32>
    %cst_98 = arith.constant 0.000000e+00 : f32
    %159 = vector.broadcast %cst_98 : f32 to vector<16x256xf32>
    %160 = arith.select %25, %158, %159 : vector<16x256xi1>, vector<16x256xf32>
    %c240_i32_99 = arith.constant 240 : i32
    %161 = tpu.dynamic_rotate %118 by %c240_i32_99 dim 1 : vector<16x256xf32>, i32 -> vector<16x256xf32>
    %cst_100 = arith.constant 0.000000e+00 : f32
    %162 = vector.broadcast %cst_100 : f32 to vector<16x256xf32>
    %163 = arith.select %27, %161, %162 : vector<16x256xi1>, vector<16x256xf32>
    %c239_i32_101 = arith.constant 239 : i32
    %164 = tpu.dynamic_rotate %118 by %c239_i32_101 dim 1 : vector<16x256xf32>, i32 -> vector<16x256xf32>
    %cst_102 = arith.constant 0.000000e+00 : f32
    %165 = vector.broadcast %cst_102 : f32 to vector<16x256xf32>
    %166 = arith.select %32, %164, %165 : vector<16x256xi1>, vector<16x256xf32>
    %167 = tpu.concatenate %121, %124, %127, %130, %103, %133, %136, %139, %142, %145, %148, %151, %154, %118, %157, %160 in 0 : vector<16x256xf32>, vector<16x256xf32>, vector<16x256xf32>, vector<16x256xf32>, vector<16x256xf32>, vector<16x256xf32>, vector<16x256xf32>, vector<16x256xf32>, vector<16x256xf32>, vector<16x256xf32>, vector<16x256xf32>, vector<16x256xf32>, vector<16x256xf32>, vector<16x256xf32>, vector<16x256xf32>, vector<16x256xf32> -> vector<256x256xf32>
    %168 = tpu.concatenate %163, %166 in 0 : vector<16x256xf32>, vector<16x256xf32> -> vector<32x256xf32>
    %169 = tpu.concatenate %167, %168 in 0 : vector<256x256xf32>, vector<32x256xf32> -> vector<288x256xf32>
    %c0_103 = arith.constant 0 : index
    %c0_104 = arith.constant 0 : index
    %170 = vector.load %arg12[%c0_103, %c0_104] : memref<16x288xbf16, #tpu.memory_space<vmem>>, vector<16x288xbf16>
    %171 = arith.truncf %169 : vector<288x256xf32> to vector<288x256xbf16>
    %cst_105 = arith.constant dense<0.000000e+00> : vector<16x256xf32>
    %172 = tpu.matmul %170, %171, %cst_105 {dimension_numbers = #tpu.dot_dimension_numbers<[1], [0], [0], [1], [0, 0, 1, 1], [], []>} : vector<16x288xbf16>, vector<288x256xbf16>, vector<16x256xf32> -> vector<16x256xf32>
    %c0_106 = arith.constant 0 : index
    %c0_107 = arith.constant 0 : index
    %173 = vector.load %arg13[%c0_106, %c0_107] : memref<16x1xf32, #tpu.memory_space<vmem>>, vector<16x1xf32>
    %174 = vector.broadcast %173 : vector<16x1xf32> to vector<16x256xf32>
    %175 = arith.addf %172, %174 : vector<16x256xf32>
    %cst_108 = arith.constant 0.000000e+00 : f32
    %176 = vector.broadcast %cst_108 : f32 to vector<16x256xf32>
    %177 = arith.maximumf %175, %176 : vector<16x256xf32>
    %c0_109 = arith.constant 0 : index
    %c0_110 = arith.constant 0 : index
    %c0_111 = arith.constant 0 : index
    %178 = vector.load %arg15[%c0_109, %c0_110, %c0_111] : memref<1x16x256xf32, #tpu.memory_space<vmem>>, vector<1x16x256xf32>
    %179 = vector.shape_cast %178 : vector<1x16x256xf32> to vector<16x256xf32>
    %180 = vector.shape_cast %177 : vector<16x256xf32> to vector<1x16x256xf32>
    tpu.vector_store %arg15[%c0_109, %c0_110, %c0_111], %180 {strides = array<i32>} : memref<1x16x256xf32, #tpu.memory_space<vmem>>, vector<1x16x256xf32>,
    return
  }
  func.func @transform_0(%arg0: i32) -> (i32, i32, i32) {
    %c0_i32 = arith.constant 0 : i32
    %c0_i32_0 = arith.constant 0 : i32
    %c0_i32_1 = arith.constant 0 : i32
    return %arg0, %c0_i32, %c0_i32_0 : i32, i32, i32
  }
  func.func @transform_1(%arg0: i32) -> (i32, i32, i32) {
    %c0_i32 = arith.constant 0 : i32
    %c0_i32_0 = arith.constant 0 : i32
    %c0_i32_1 = arith.constant 0 : i32
    return %arg0, %c0_i32, %c0_i32_0 : i32, i32, i32
  }
  func.func @transform_2(%arg0: i32) -> (i32, i32, i32) {
    %c0_i32 = arith.constant 0 : i32
    %c0_i32_0 = arith.constant 0 : i32
    %c0_i32_1 = arith.constant 0 : i32
    return %arg0, %c0_i32, %c0_i32_0 : i32, i32, i32
  }
  func.func @transform_3(%arg0: i32) -> (i32, i32) {
    %c0_i32 = arith.constant 0 : i32
    %c0_i32_0 = arith.constant 0 : i32
    %c0_i32_1 = arith.constant 0 : i32
    return %c0_i32, %c0_i32_0 : i32, i32
  }
  func.func @transform_4(%arg0: i32) -> (i32, i32) {
    %c0_i32 = arith.constant 0 : i32
    %c0_i32_0 = arith.constant 0 : i32
    %c0_i32_1 = arith.constant 0 : i32
    return %c0_i32, %c0_i32_0 : i32, i32
  }
  func.func @transform_5(%arg0: i32) -> (i32, i32) {
    %c0_i32 = arith.constant 0 : i32
    %c0_i32_0 = arith.constant 0 : i32
    %c0_i32_1 = arith.constant 0 : i32
    return %c0_i32, %c0_i32_0 : i32, i32
  }
  func.func @transform_6(%arg0: i32) -> (i32, i32) {
    %c0_i32 = arith.constant 0 : i32
    %c0_i32_0 = arith.constant 0 : i32
    %c0_i32_1 = arith.constant 0 : i32
    return %c0_i32, %c0_i32_0 : i32, i32
  }
  func.func @transform_7(%arg0: i32) -> (i32, i32) {
    %c0_i32 = arith.constant 0 : i32
    %c0_i32_0 = arith.constant 0 : i32
    %c0_i32_1 = arith.constant 0 : i32
    return %c0_i32, %c0_i32_0 : i32, i32
  }
  func.func @transform_8(%arg0: i32) -> (i32, i32) {
    %c0_i32 = arith.constant 0 : i32
    %c0_i32_0 = arith.constant 0 : i32
    %c0_i32_1 = arith.constant 0 : i32
    return %c0_i32, %c0_i32_0 : i32, i32
  }
  func.func @transform_9(%arg0: i32) -> (i32, i32) {
    %c0_i32 = arith.constant 0 : i32
    %c0_i32_0 = arith.constant 0 : i32
    %c0_i32_1 = arith.constant 0 : i32
    return %c0_i32, %c0_i32_0 : i32, i32
  }
  func.func @transform_10(%arg0: i32) -> (i32, i32) {
    %c0_i32 = arith.constant 0 : i32
    %c0_i32_0 = arith.constant 0 : i32
    %c0_i32_1 = arith.constant 0 : i32
    return %c0_i32, %c0_i32_0 : i32, i32
  }
  func.func @transform_11(%arg0: i32) -> (i32, i32) {
    %c0_i32 = arith.constant 0 : i32
    %c0_i32_0 = arith.constant 0 : i32
    %c0_i32_1 = arith.constant 0 : i32
    return %c0_i32, %c0_i32_0 : i32, i32
  }
  func.func @transform_12(%arg0: i32) -> (i32, i32) {
    %c0_i32 = arith.constant 0 : i32
    %c0_i32_0 = arith.constant 0 : i32
    %c0_i32_1 = arith.constant 0 : i32
    return %c0_i32, %c0_i32_0 : i32, i32
  }
  func.func @transform_13(%arg0: i32) -> (i32, i32, i32) {
    %c0_i32 = arith.constant 0 : i32
    %c0_i32_0 = arith.constant 0 : i32
    %c0_i32_1 = arith.constant 0 : i32
    return %arg0, %c0_i32, %c0_i32_0 : i32, i32, i32
  }
  func.func @transform_14(%arg0: i32) -> (i32, i32, i32) {
    %c0_i32 = arith.constant 0 : i32
    %c0_i32_0 = arith.constant 0 : i32
    %c0_i32_1 = arith.constant 0 : i32
    return %arg0, %c0_i32, %c0_i32_0 : i32, i32, i32
  }
}

</mosaic_0001>

<bundles_post_ra>
// kernel: _lambda_.1
= control target key start
LH: loop header
LB: loop body
LE: loop exit
PB: predicated region body
PF: predicated region fallthrough
CT: control target
= control target key end

     0   :  { %s2550_s29 = smov 0   ;;  %s3342_s0 = inlined_call_operand.vmem [shape: f32[2,16,256], index: 0, kind: input, shape index: {}]   ;;  %s3343_s1 = inlined_call_operand.vmem [shape: f32[2,24,64], index: 1, kind: input, shape index: {}]   ;;  %s3344_s2 = inlined_call_operand.vmem [shape: f32[2,32,16], index: 2, kind: input, shape index: {}]   ;;  %s3345_s3 = inlined_call_operand.vmem [shape: bf16[16,24], index: 3, kind: input, shape index: {}]   ;;  %s3346_s4 = inlined_call_operand.vmem [shape: f32[16,1], index: 4, kind: input, shape index: {}]   ;;  %s3347_s5 = inlined_call_operand.vmem [shape: f32[64,256], index: 5, kind: input, shape index: {}]   ;;  %s3348_s6 = inlined_call_operand.vmem [shape: bf16[16,32], index: 6, kind: input, shape index: {}]   ;;  %s3349_s7 = inlined_call_operand.vmem [shape: f32[16,1], index: 7, kind: input, shape index: {}]   ;;  %s3350_s8 = inlined_call_operand.vmem [shape: f32[16,256], index: 8, kind: input, shape index: {}]   ;;  %s3351_s9 = inlined_call_operand.vmem [shape: bf16[16,288], index: 9, kind: input, shape index: {}]   ;;  %s3352_s10 = inlined_call_operand.vmem [shape: f32[16,1], index: 10, kind: input, shape index: {}]   ;;  %s3353_s11 = inlined_call_operand.vmem [shape: bf16[16,288], index: 11, kind: input, shape index: {}]   ;;  %s3354_s12 = inlined_call_operand.vmem [shape: f32[16,1], index: 12, kind: input, shape index: {}]   ;;  %s3355_s13 = inlined_call_operand.vmem [shape: f32[2,16,256], index: 13, kind: output, shape index: {0}]   ;;  %s3356_s14 = inlined_call_operand.vmem [shape: f32[2,16,256], index: 14, kind: output, shape index: {1}]  }
   0x1 LB: > { %s1842_s30 = sadd.s32 4294967295, %s2462_s29   ;;  %p1846_p0 = scmp.ge.s32.totalorder %s2462_s29, 1  ;;  %s2462_s29 = sphi %s2550_s29, %s25_s29  }
   0x2   : > { %p435_p1 = scmp.lt.s32.totalorder %s2462_s29, 3 }
   0x4   : > { %p436_p2 = pnand %p1846_p0, %p435_p1 }
   0x5   : > { %p496_p3 = scmp.lt.s32.totalorder (!%p436_p2), %s1842_s30, 1  ;;  %v2464_v0 = vmov (!%p436_p2), 0.0   ;;  %vm2465_vm0 = vmmov (!%p436_p2), 0   ;;  %v554_v1 = vld [vmem:[%s3346_s4] sm:$0xff] (!%p436_p2)  ;;  %v2466_v2 = vmov (!%p436_p2), 0   ;;  %v555_v3 = vld [vmem:[%s3346_s4 + $0x8] sm:$0xff] (!%p436_p2)  ;;  %v526_v59 = vlaneseq (!%p436_p2) }
   0x6   : > { %439 = sbr.rel (%p436_p2) target bundleno = 1261 (0x4ed), region = 72  ;;  %2052 = vmatprep.subr.bf16.mxu0 (!%p436_p2), %v2464_v0  ;;  %2056 = vmatprep.mubr.msk.bf16.mxu0 (!%p436_p2), %vm2465_vm0, %v2464_v0  ;;  %v623_v6 = vld [vmem:[%s3347_s5 + $0x8] sm:$0xff] (!%p436_p2)  ;;  %vm575_vm1 = vcmask (!%p436_p2), 1043456   ;;  %v625_v9 = vld [vmem:[%s3347_s5 + $0x18] sm:$0xff] (!%p436_p2)  ;;  %v622_v11 = vld [vmem:[%s3347_s5] sm:$0xff] (!%p436_p2)  ;;  %vm571_vm2 = vcmask (!%p436_p2), 195584  }
   0x7   : > { %2124 = vset.pattern.permute.xlu0 (!%p436_p2), %v2466_v2  ;;  %2060 = vmatprep.subr.bf16.mxu1 (!%p436_p2), %v2464_v0  ;;  %v624_v12 = vld [vmem:[%s3347_s5 + $0x10] sm:$0xff] (!%p436_p2)  ;;  %v2068_v14 = vpack.c.bf16 (!%p436_p2), %v625_v9, %v623_v6  ;;  %v627_v15 = vld [vmem:[%s3347_s5 + $0x28] sm:$0xff] (!%p436_p2)  ;;  %v629_v16 = vld [vmem:[%s3347_s5 + $0x38] sm:$0xff] (!%p436_p2)  ;;  %s2467_s21 = smov (!%p436_p2), 17   ;;  %s2469_s23 = smov (!%p436_p2), 15   ;;  %vm3357_vm3 = vcmask (!%p436_p2), 261120  }
   0x8   : > { %558 = vperm.xlu0 (!%p436_p2), %2124, %v554_v1   ;;  %2064 = vmatprep.mubr.msk.bf16.mxu1 (!%p436_p2), %vm2465_vm0, %v2464_v0  ;;  %v2446_v17 = vld [vmem:[%s3345_s3] sm:$0xff] (!%p436_p2)   ;;  %v2070_v18 = vpack.c.bf16 (!%p436_p2), %v624_v12, %v622_v11  ;;  %v2072_v19 = vpack.c.bf16 (!%p436_p2), %v629_v16, %v627_v15  ;;  %v628_v21 = vld [vmem:[%s3347_s5 + $0x30] sm:$0xff] (!%p436_p2)  ;;  %v631_v22 = vld [vmem:[%s3347_s5 + $0x48] sm:$0xff] (!%p436_p2)  ;;  %s2470_s26 = smov (!%p436_p2), 1   ;;  %s3367_s27 = smov (!%p436_p2), 127   ;;  %vm638_vm4 = vcmask (!%p436_p2), 523264  }
   0x9   : > { %2285 = vset.pattern.permute.xlu1 (!%p436_p2), %v2466_v2  ;;  %v626_v20 = vld [vmem:[%s3347_s5 + $0x20] sm:$0xff] (!%p436_p2)  ;;  %v633_v23 = vld [vmem:[%s3347_s5 + $0x58] sm:$0xff] (!%p436_p2)  ;;  %v632_v27 = vld [vmem:[%s3347_s5 + $0x50] sm:$0xff] (!%p436_p2)  ;;  %s3365_s28 = smov (!%p436_p2), 113   ;;  %s3363_s16 = smov (!%p436_p2), 112   ;;  %v2675_v63 = vand.u32 (!%p436_p2), 127, %v526_v59 }
   0xa   : > { %v2074_v24 = vpack.c.bf16 (!%p436_p2), %v628_v21, %v626_v20  ;;  %v2076_v25 = vpack.c.bf16 (!%p436_p2), %v633_v23, %v631_v22  ;;  %v630_v26 = vld [vmem:[%s3347_s5 + $0x40] sm:$0xff] (!%p436_p2)  ;;  %v635_v29 = vld [vmem:[%s3347_s5 + $0x68] sm:$0xff] (!%p436_p2)  ;;  %v637_v30 = vld [vmem:[%s3347_s5 + $0x78] sm:$0xff] (!%p436_p2)  ;;  %s3421_s25 = smov (!%p436_p2), 127   ;;  %s3423_s19 = smov (!%p436_p2), 112  }
   0xb   : > { %v2078_v28 = vpack.c.bf16 (!%p436_p2), %v632_v27, %v630_v26  ;;  %v2080_v31 = vpack.c.bf16 (!%p436_p2), %v637_v30, %v635_v29  ;;  %v634_v32 = vld [vmem:[%s3347_s5 + $0x60] sm:$0xff] (!%p436_p2)  ;;  %v636_v33 = vld [vmem:[%s3347_s5 + $0x70] sm:$0xff] (!%p436_p2)  ;;  %vm3371_vm5 = vcmp.lt.s32.totalorder (!%p436_p2), %v2675_v63, 17  ;;  %vm531_vm6 = vcmp.ge.s32.totalorder (!%p436_p2), %v2675_v63, 16 }
   0xc   : > { %563 = vperm.xlu0 (!%p436_p2), %2124, %v555_v3   ;;  %v2082_v34 = vpack.c.bf16 (!%p436_p2), %v636_v33, %v634_v32  ;;  %v2447_v47 = vld [vmem:[%s3348_s6] sm:$0xff] (!%p436_p2)   ;;  %vm747_vm8 = vcmp.lt.s32.totalorder (!%p436_p2), %v2675_v63, 16  ;;  %vm3359_vm13 = vcmp.lt.s32.totalorder (!%p436_p2), %v2675_v63, 15  ;;  %vm2740_vm0 = vmpackc.low (!%p436_p2), %vm531_vm6, %vm531_vm6 }
   0xd   : > { %s3475_s30 = smov (!%p496_p3, %s1842_s30), 1 }
   0xe   : > { %s2104_s17 = smul.u32 24, %s3475_s30  ;;  %s2630_s15 = sshll.u32 %s3475_s30, 5 }
   0xf   : > { %s500_s18 = scalar_lea.vmem %s3342_s0, %s2630_s15  ;;  %s510_s30 = scalar_lea.vmem %s3344_s2, %s2630_s15 }
  0x10   : > { %s505_s22 = scalar_lea.vmem %s3343_s1, %s2104_s17  ;;  %v2636_v35 = vld [vmem:[%s500_s18] sm:$0xff]  ;;  %v2638_v36 = vld [vmem:[%s500_s18 + $0x10] sm:$0xff]  ;;  %v2640_v37 = vld [vmem:[%s500_s18 + $0x8] sm:$0xff]  ;;  %s3369_s17 = smov 111  }
  0x11   : > { %v547_v4 = vld [vmem:[%s505_s22] sm:$0xff]  ;;  %v548_v5 = vld [vmem:[%s505_s22 + $0x8] sm:$0xff]  ;;  %v549_v8 = vld [vmem:[%s505_s22 + $0x10] sm:$0xff]  ;;  %v2125_v39 = vpack.i.bf16 %v2638_v36, %v2636_v35  ;;  %s2468_s22 = smov 16   ;;  %s515_s24 = scalar_lea.vmem %s3355_s13, %s2630_s15 }
  0x12   : > { %v552_v7 = vpack.c.bf16 %v548_v5, %v547_v4  ;;  %v553_v10 = vpack.c.bf16 %v549_v8, %v549_v8  ;;  %v2642_v38 = vld [vmem:[%s500_s18 + $0x18] sm:$0xff]  ;;  %v1151_v40 = vld [vmem:[%s510_s30] sm:$0xff]  ;;  %v1152_v41 = vld [vmem:[%s510_s30 + $0x8] sm:$0xff]  ;;  %v2679_v5 = vadd.s32 128, %v2675_v63  ;;  %s3422_s18 = smov 113  }
  0x13   : > { %v1153_v42 = vld [vmem:[%s510_s30 + $0x10] sm:$0xff]  ;;  %v1157_v43 = vpack.c.bf16 %v1152_v41, %v1151_v40  ;;  %v1154_v44 = vld [vmem:[%s510_s30 + $0x18] sm:$0xff]  ;;  %2126 = vrot.lane.b32.xlu1 %v2125_v39, %s2467_s21  ;;  %v2130_v45 = vpack.i.bf16 %v2642_v38, %v2640_v37  ;;  %2136 = vrot.lane.b32.xlu0 %v2125_v39, %s2468_s22 }
  0x14   : > { %2053 = vmatpush3.bf16.msra.mxu0 %v552_v7  ;;  %v577_v13 = vsel %vm575_vm1, %v553_v10, 0  ;;  %v1158_v46 = vpack.c.bf16 %v1154_v44, %v1153_v42  ;;  %v529_v7 = vand.u32 15, %v2675_v63  ;;  %v530_v15 = vand.u32 15, %v2679_v5 }
  0x15   : > { %2054 = vmatprep.subr.bf16.mxu0 %v2464_v0  ;;  %2061 = vmatpush3.bf16.msra.mxu1 %v1157_v43 }
  0x16   : > { %2062 = vmatprep.subr.bf16.mxu1 %v2464_v0  ;;  %vm2692_vm7 = vcmp.ge.s32.totalorder %v529_v7, 1  ;;  %vm2701_vm10 = vcmp.ge.s32.totalorder %v530_v15, 1  ;;  %vm2727_vm14 = vcmp.lt.s32.totalorder %v530_v15, 15  ;;  %vm2731_vm15 = vcmp.lt.s32.totalorder %v529_v7, 15 }
  0x17   : > { %2131 = vrot.lane.b32.xlu1 %v2130_v45, %s2467_s21  ;;  %2146 = vrot.lane.b32.xlu0 %v2125_v39, %s2469_s23  ;;  %vm535_vm9 = vmand %vm531_vm6, %vm2692_vm7 }
  0x18   : > { %2055 = vmatpush3.bf16.msra.mxu0 %v577_v13  ;;  %vm2705_vm11 = vmpackc.low %vm535_vm9, %vm535_vm9 }
  0x19   : > { %2069 = vmatprep.subr.bf16.mxu0 %v2068_v14  ;;  %2063 = vmatpush3.bf16.msra.mxu1 %v1158_v46  ;;  %vm2712_vm12 = vmpackc.low %vm2701_vm10, %vm2701_vm10 }
  0x1a   : > { %vm2747_vm1 = vmpackc.low %vm2727_vm14, %vm2727_vm14 }
  0x1b   : > { %2057 = vmatmul.mubr.msk.bf16.vlgmr.msra.gmra.mrb[0].mxu0 %vm571_vm2, %v2446_v17  ;;  %2141 = vrot.lane.b32.xlu1 %v2130_v45, %s2468_s22  ;;  %vm539_vm2 = vmand %vm531_vm6, %vm2731_vm15  ;;  %vm3360_vm6 = vcmp.lt.s32.totalorder %v2675_v63, 127 }
  0x1c   : > { %2071 = vmatpush1.bf16.msra.mxu0 %v2070_v18  ;;  %709 = vmatprep.mubr.f32.mxu0 %v2464_v0  ;;  %vm2768_vm9 = vmpackc.low %vm539_vm2, %vm539_vm2 }
  0x1d   : > { %2073 = vmatprep.subr.bf16.mxu0 %v2072_v19  ;;  %2156 = vrot.lane.b32.xlu0 %v2125_v39, %s2470_s26  ;;  %vm2786_vm2 = vmpackc.low %vm2692_vm7, %vm2692_vm7  ;;  %vm542_vm7 = vcmp.lt.s32.totalorder %v2679_v5, 240 }
  0x1e   : > { %2065 = vmatmul.mubr.msk.bf16.vlgmr.msra.gmra.mrb[0].mxu1 %vm3357_vm3, %v2447_v47  ;;  %vm3362_vm3 = vcmp.lt.s32.totalorder %v2675_v63, 113 }
  0x1f   : > { %1297 = vmatprep.mubr.f32.mxu1 %v2464_v0  ;;  %2151 = vrot.lane.b32.xlu1 %v2130_v45, %s2469_s23 }
  0x20   : > { %2075 = vmatpush1.bf16.msra.mxu0 %v2074_v24 }
  0x21   : > { %2077 = vmatprep.subr.bf16.mxu0 %v2076_v25  ;;  %2166 = vrot.lane.b32.xlu0 %v2125_v39, %s3367_s27 }
  0x23   : > { %2161 = vrot.lane.b32.xlu1 %v2130_v45, %s2470_s26 }
  0x24   : > { %2079 = vmatpush1.bf16.msra.mxu0 %v2078_v28 }
  0x25   : > { %2081 = vmatprep.subr.bf16.mxu0 %v2080_v31  ;;  %2176 = vrot.lane.b32.xlu0 %v2125_v39, %s3365_s28 }
  0x27   : > { %2171 = vrot.lane.b32.xlu1 %v2130_v45, %s3367_s27 }
  0x28   : > { %2083 = vmatpush1.bf16.msra.mxu0 %v2082_v34 }
  0x29   : > { %2186 = vrot.lane.b32.xlu0 %v2125_v39, %s3363_s16 }
  0x2b   : > { %2181 = vrot.lane.b32.xlu1 %v2130_v45, %s3365_s28 }
  0x2d   : > { %2196 = vrot.lane.b32.xlu0 %v2125_v39, %s3369_s17 }
  0x2f   : > { %2191 = vrot.lane.b32.xlu1 %v2130_v45, %s3363_s16 }
  0x33   : > { %2201 = vrot.lane.b32.xlu1 %v2130_v45, %s3369_s17 }
  0x85   : > { %v2127_v58 = vpop.permute.xlu1 %2126 }
  0x86   : > { %v2129_v61 = vunpack.i.h.bf16 %v2127_v58  ;;  %v2128_v62 = vunpack.i.l.bf16 %v2127_v58 }
  0x87   : > { %v559_v48 = vpop.permute.xlu0 %558 }
  0x89   : > { %v2132_v1 = vpop.permute.xlu1 %2131 }
  0x8a   : > { %v2134_v3 = vunpack.i.h.bf16 %v2132_v1  ;;  %v2133_v4 = vunpack.i.l.bf16 %v2132_v1 }
  0x8b   : > { %v564_v52 = vpop.permute.xlu0 %563 }
  0x8c   : > { %v731_v10 = vsel %vm3371_vm5, %v2128_v62, %v2133_v4  ;;  %v732_v11 = vsel %vm3371_vm5, %v2129_v61, %v2134_v3  ;;  %v733_v12 = vsel %vm3371_vm5, %v2133_v4, %v2128_v62  ;;  %v734_v13 = vsel %vm3371_vm5, %v2134_v3, %v2129_v61 }
  0x8d   : > { %v1864_v14 = vpack.c.bf16 %v732_v11, %v731_v10  ;;  %v2142_v17 = vpop.permute.xlu1 %2141  ;;  %v1867_v18 = vpack.c.bf16 %v734_v13, %v733_v12  ;;  %v999_v10 = vpack.c.bf16 %v2642_v38, %v2640_v37 }
  0x8e   : > { %v2144_v19 = vunpack.i.h.bf16 %v2142_v17  ;;  %v2143_v20 = vunpack.i.l.bf16 %v2142_v17  ;;  %v998_v17 = vpack.c.bf16 %v2638_v36, %v2636_v35 }
  0x8f   : > { %v2137_v60 = vpop.permute.xlu0 %2136  ;;  %1865 = vmatprep.subr.msk.bf16.mxu0 %vm2712_vm12, %v1864_v14 }
  0x90   : > { %v2139_v8 = vunpack.i.h.bf16 %v2137_v60  ;;  %v2138_v9 = vunpack.i.l.bf16 %v2137_v60 }
  0x91   : > { %v2152_v31 = vpop.permute.xlu1 %2151 }
  0x92   : > { %v751_v27 = vsel %vm747_vm8, %v2144_v19, %v2139_v8  ;;  %v750_v28 = vsel %vm747_vm8, %v2143_v20, %v2138_v9  ;;  %v748_v29 = vsel %vm747_vm8, %v2138_v9, %v2143_v20  ;;  %v749_v30 = vsel %vm747_vm8, %v2139_v8, %v2144_v19 }
  0x93   : > { %v2147_v6 = vpop.permute.xlu0 %2146  ;;  %v993_v32 = vpack.c.bf16 %v749_v30, %v748_v29  ;;  %v1870_v39 = vpack.c.bf16 %v751_v27, %v750_v28  ;;  %v2154_v40 = vunpack.i.h.bf16 %v2152_v31  ;;  %v2153_v41 = vunpack.i.l.bf16 %v2152_v31 }
  0x94   : > { %v2149_v24 = vunpack.i.h.bf16 %v2147_v6  ;;  %v2148_v25 = vunpack.i.l.bf16 %v2147_v6 }
  0x96   : > { %v766_v47 = vsel %vm3359_vm13, %v2149_v24, %v2154_v40 }
  0x97   : > { %v2157_v21 = vpop.permute.xlu0 %2156 }
  0x98   : > { %v2159_v44 = vunpack.i.h.bf16 %v2157_v21  ;;  %v2158_v45 = vunpack.i.l.bf16 %v2157_v21 }
  0x9b   : > { %v2167_v43 = vpop.permute.xlu0 %2166 }
  0x9c   : > { %v2168_v58 = vunpack.i.l.bf16 %v2167_v43 }
  0x9f   : > { %v2177_v59 = vpop.permute.xlu0 %2176 }
  0xa0   : > { %v2179_v13 = vunpack.i.h.bf16 %v2177_v59  ;;  %v2178_v14 = vunpack.i.l.bf16 %v2177_v59 }
  0xa3   : > { %v2187_v16 = vpop.permute.xlu0 %2186 }
  0xa4   : > { %v2188_v35 = vunpack.i.l.bf16 %v2187_v16 }
  0xee   : > { %v613_v49 = vpop.f32.mrb[0].mxu0 }
  0xef   : > { %v614_v50 = vadd.f32 %v613_v49, %v559_v48  ;;  %v2058_v51 = vpop.f32.mrb[1].mxu0  ;;  %v768_v48 = vsel %vm3359_vm13, %v2154_v40, %v2149_v24  ;;  %v765_v49 = vsel %vm3359_vm13, %v2148_v25, %v2153_v41 }
  0xf0   : > { %v616_v53 = vpop.f32.mrb[2].mxu0  ;;  %v1873_v51 = vpack.c.bf16 %v766_v47, %v765_v49  ;;  %v2197_v49 = vpop.permute.xlu0 %2196  ;;  %v2455_v47 = vld [vmem:[%s3353_s11 + $0x8] ss:$12 sps:$4 sm:$0xff]  }
  0xf1   : > { %v620_v54 = vmax.f32 %v614_v50, 0.0  ;;  %v617_v55 = vadd.f32 %v616_v53, %v564_v52  ;;  %v2059_v56 = vpop.f32.mrb[3].mxu0  ;;  %v767_v50 = vsel %vm3359_vm13, %v2153_v41, %v2148_v25  ;;  %v2162_v52 = vpop.permute.xlu1 %2161  ;;  %v2189_v25 = vunpack.i.h.bf16 %v2187_v16  ;;  %vm544_vm13 = vmand %vm542_vm7, %vm2701_vm10  ;;  %v1223_v16 = vld [vmem:[%s3350_s8 + $0x8] sm:$0xff] }
  0xf2   : > { %v1876_v53 = vpack.c.bf16 %v768_v48, %v767_v50  ;;  %vm2834_vm10 = vmpackc.low %vm544_vm13, %vm544_vm13 }
  0xf3   : > { %1858 = vmatmul.mubr.msk.f32.vlgmr.msra.gmra.mrb[4].mxu0 %vm638_vm4, %v620_v54  ;;  %v621_v57 = vmax.f32 %v617_v55, 0.0  ;;  %v2164_v54 = vunpack.i.h.bf16 %v2162_v52  ;;  %v2163_v55 = vunpack.i.l.bf16 %v2162_v52  ;;  %vm2849_vm13 = vmpackc.low %vm542_vm7, %vm542_vm7  ;;  %v2198_v52 = vunpack.i.l.bf16 %v2197_v49 }
  0xf4   : > { %715 = vmatprep.mubr.f32.mxu0 %v2464_v0  ;;  %1868 = vmatpush1.bf16.msk.msra.mxu0 %vm2705_vm11, %v1867_v18 }
  0xf5   : > { %1059 = vmatprep.subr.bf16.mxu0 %v993_v32  ;;  %v2172_v4 = vpop.permute.xlu1 %2171 }
  0xf6   : > { %v2174_v7 = vunpack.i.h.bf16 %v2172_v4  ;;  %v2173_v8 = vunpack.i.l.bf16 %v2172_v4 }
  0xf7   : > { %1859 = vmatmul.mubr.msk.f32.gmra.mrb[6].mxu0 %vm638_vm4, %v621_v57  ;;  %vm3358_vm4 = vcmp.lt.s32.totalorder %v2675_v63, 1  ;;  %v2169_v57 = vunpack.i.h.bf16 %v2167_v43 }
  0xf8   : > { %1871 = vmatpush1.bf16.msk.msra.mxu0 %vm2740_vm0, %v1870_v39  ;;  %v783_v60 = vsel %vm3358_vm4, %v2159_v44, %v2164_v54  ;;  %v785_v61 = vsel %vm3358_vm4, %v2164_v54, %v2159_v44  ;;  %v782_v62 = vsel %vm3358_vm4, %v2158_v45, %v2163_v55  ;;  %v784_v1 = vsel %vm3358_vm4, %v2163_v55, %v2158_v45 }
  0xf9   : > { %1874 = vmatprep.subr.msk.bf16.mxu0 %vm2747_vm1, %v1873_v51  ;;  %v1879_v3 = vpack.c.bf16 %v783_v60, %v782_v62  ;;  %v1882_v6 = vpack.c.bf16 %v785_v61, %v784_v1  ;;  %v802_v11 = vsel %vm3360_vm6, %v2174_v7, %v2169_v57  ;;  %v801_v12 = vsel %vm3360_vm6, %v2173_v8, %v2168_v58  ;;  %v2182_v15 = vpop.permute.xlu1 %2181 }
  0xfa   : > { %v2184_v18 = vunpack.i.h.bf16 %v2182_v15  ;;  %v2183_v37 = vunpack.i.l.bf16 %v2182_v15  ;;  %v800_v38 = vsel %vm3360_vm6, %v2169_v57, %v2174_v7  ;;  %v799_v19 = vsel %vm3360_vm6, %v2168_v58, %v2173_v8  ;;  %vm2820_vm6 = vmpackc.low %vm2731_vm15, %vm2731_vm15  ;;  %v1026_v15 = vld [vmem:[%s3352_s10] sm:$0xff] }
  0xfb   : > { %v1885_v20 = vpack.c.bf16 %v802_v11, %v801_v12  ;;  %vm3361_vm4 = vcmp.lt.s32.totalorder %v2675_v63, 112  ;;  %v1888_v27 = vpack.c.bf16 %v800_v38, %v799_v19  ;;  %vm849_vm15 = vcmp.lt.s32.totalorder %v2675_v63, 111  ;;  %v2911_v11 = vpop.f32.mrb[0].mxu1  ;;  %v1222_v38 = vld [vmem:[%s3350_s8] sm:$0xff]  ;;  %v1224_v19 = vld [vmem:[%s3350_s8 + $0x10] sm:$0xff] }
  0xfc   : > { %1877 = vmatpush1.bf16.msk.msra.mxu0 %vm2768_vm9, %v1876_v53  ;;  %v819_v21 = vsel %vm3362_vm3, %v2184_v18, %v2179_v13  ;;  %v818_v24 = vsel %vm3362_vm3, %v2183_v37, %v2178_v14  ;;  %v817_v31 = vsel %vm3362_vm3, %v2179_v13, %v2184_v18  ;;  %v816_v22 = vsel %vm3362_vm3, %v2178_v14, %v2183_v37  ;;  %v2066_v12 = vpop.f32.mrb[1].mxu1  ;;  %v1159_v13 = vld [vmem:[%s3349_s7] sm:$0xff]  ;;  %v1160_v14 = vld [vmem:[%s3349_s7 + $0x8] sm:$0xff] }
  0xfd   : > { %1880 = vmatprep.subr.msk.bf16.mxu0 %vm2712_vm12, %v1879_v3  ;;  %v2192_v36 = vpop.permute.xlu1 %2191  ;;  %v1891_v32 = vpack.c.bf16 %v819_v21, %v818_v24  ;;  %v1894_v41 = vpack.c.bf16 %v817_v31, %v816_v22  ;;  %v2199_v51 = vunpack.i.h.bf16 %v2197_v49  ;;  %v1027_v18 = vld [vmem:[%s3352_s10 + $0x8] sm:$0xff]  ;;  %v2086_v21 = vpack.c.bf16 %v1224_v19, %v1222_v38 }
  0xfe   : > { %v2194_v28 = vunpack.i.h.bf16 %v2192_v36  ;;  %v2193_v29 = vunpack.i.l.bf16 %v2192_v36 }
 0x100   : > { %1883 = vmatpush1.bf16.msk.msra.mxu0 %vm2786_vm2, %v1882_v6  ;;  %v836_v39 = vsel %vm3361_vm4, %v2194_v28, %v2189_v25  ;;  %v835_v34 = vsel %vm3361_vm4, %v2193_v29, %v2188_v35  ;;  %v834_v43 = vsel %vm3361_vm4, %v2189_v25, %v2194_v28  ;;  %v833_v44 = vsel %vm3361_vm4, %v2188_v35, %v2193_v29  ;;  %vm546_vm4 = vmand %vm542_vm7, %vm2727_vm14 }
 0x101   : > { %1065 = vmatprep.subr.bf16.mxu0 %v999_v10  ;;  %v1897_v45 = vpack.c.bf16 %v836_v39, %v835_v34  ;;  %v1004_v48 = vpack.c.bf16 %v834_v43, %v833_v44  ;;  %v2202_v50 = vpop.permute.xlu1 %2201  ;;  %vm2870_vm3 = vmpackc.low %vm546_vm4, %vm546_vm4  ;;  %v2450_v10 = vld [vmem:[%s3351_s9 + $0x4] ss:$12 sps:$4 sm:$0xff]   ;;  %vm3400_vm14 = vcmp.lt.s32.totalorder %v2675_v63, 15 }
 0x102   : > { %v2204_v53 = vunpack.i.h.bf16 %v2202_v50  ;;  %v2203_v54 = vunpack.i.l.bf16 %v2202_v50  ;;  %1089 = vmatprep.mubr.bf16.mxu0 %v2450_v10  ;;  %vm3401_vm4 = vmmov %vm3400_vm14 }
 0x103   : > { %vm3402_vm7 = vmmov %vm3401_vm4 }
 0x104   : > { %1066 = vmatpush1.bf16.msra.mxu0 %v998_v17  ;;  %v851_v55 = vsel %vm849_vm15, %v2199_v51, %v2204_v53  ;;  %v853_v57 = vsel %vm849_vm15, %v2204_v53, %v2199_v51  ;;  %v850_v58 = vsel %vm849_vm15, %v2198_v52, %v2203_v54  ;;  %v852_v59 = vsel %vm849_vm15, %v2203_v54, %v2198_v52  ;;  %v1225_v17 = vld [vmem:[%s3350_s8 + $0x18] sm:$0xff] }
 0x105   : > { %1886 = vmatprep.subr.msk.bf16.mxu0 %vm2747_vm1, %v1885_v20  ;;  %v1900_v60 = vpack.c.bf16 %v853_v57, %v852_v59  ;;  %v1903_v61 = vpack.c.bf16 %v851_v55, %v850_v58  ;;  %v2084_v37 = vpack.c.bf16 %v1225_v17, %v1223_v16  ;;  %v2939_v20 = vpop.f32.mrb[2].mxu1 }
 0x106   : > { %v2067_v24 = vpop.f32.mrb[3].mxu1 }
 0x107   : > { %2085 = vmatprep.subr.bf16.mxu1 %v2084_v37 }
 0x108   : > { %1889 = vmatpush1.bf16.msk.msra.mxu0 %vm2820_vm6, %v1888_v27  ;;  %2087 = vmatpush1.bf16.msra.mxu1 %v2086_v21 }
 0x109   : > { %1892 = vmatprep.subr.msk.bf16.mxu0 %vm2834_vm10, %v1891_v32 }
 0x10c   : > { %1895 = vmatpush1.bf16.msk.msra.mxu0 %vm2786_vm2, %v1894_v41 }
 0x10d   : > { %1898 = vmatprep.subr.msk.bf16.mxu0 %vm2849_vm13, %v1897_v45 }
 0x110   : > { %1072 = vmatpush1.bf16.msra.mxu0 %v1004_v48 }
 0x111   : > { %1901 = vmatprep.subr.msk.bf16.mxu0 %vm2870_vm3, %v1900_v60 }
 0x114   : > { %1904 = vmatpush1.bf16.msk.msra.mxu0 %vm2820_vm6, %v1903_v61 }
 0x1c6   : > { %v2878_v1 = vpop.f32.mrb[4].mxu0 }
 0x1c7   : > { %v2880_v3 = vpop.f32.mrb[5].mxu0 }
 0x1ca   : > { %v2882_v4 = vpop.f32.mrb[6].mxu0 }
 0x1cb   : > { %v2884_v33 = vpop.f32.mrb[7].mxu0  ;;  %v2205_v5 = vpack.i.bf16 %v2882_v4, %v2878_v1  ;;  %v1016_v8 = vpack.c.bf16 %v2882_v4, %v2878_v1 }
 0x1cc   : > { %v2225_v6 = vpack.i.bf16 %v2884_v33, %v2880_v3  ;;  %v1017_v7 = vpack.c.bf16 %v2884_v33, %v2880_v3 }
 0x1cd   : > { %2206 = vrot.lane.b32.xlu0 %v2205_v5, %s2467_s21 }
 0x1ce   : > { %2226 = vrot.lane.b32.xlu1 %v2225_v6, %s2467_s21 }
 0x1d1   : > { %2211 = vrot.lane.b32.xlu0 %v2205_v5, %s2468_s22 }
 0x1d2   : > { %2231 = vrot.lane.b32.xlu1 %v2225_v6, %s2468_s22 }
 0x1d5   : > { %2216 = vrot.lane.b32.xlu0 %v2205_v5, %s2469_s23 }
 0x1d6   : > { %2236 = vrot.lane.b32.xlu1 %v2225_v6, %s2469_s23 }
 0x1d9   : > { %2221 = vrot.lane.b32.xlu0 %v2205_v5, %s2470_s26 }
 0x1da   : > { %2241 = vrot.lane.b32.xlu1 %v2225_v6, %s2470_s26 }
 0x1dd   : > { %2246 = vrot.lane.b32.xlu0 %v2205_v5, %s3367_s27 }
 0x1de   : > { %2256 = vrot.lane.b32.xlu1 %v2225_v6, %s3367_s27  ;;  %s3424_s27 = smov 111  }
 0x1e1   : > { %2251 = vrot.lane.b32.xlu0 %v2205_v5, %s3365_s28 }
 0x1e2   : > { %2261 = vrot.lane.b32.xlu1 %v2225_v6, %s3365_s28 }
 0x1e5   : > { %2266 = vrot.lane.b32.xlu0 %v2205_v5, %s3363_s16 }
 0x1e6   : > { %2276 = vrot.lane.b32.xlu1 %v2225_v6, %s3363_s16 }
 0x1e9   : > { %2271 = vrot.lane.b32.xlu0 %v2205_v5, %s3369_s17 }
 0x1ea   : > { %2281 = vrot.lane.b32.xlu1 %v2225_v6, %s3369_s17 }
 0x1ed   : > { %1163 = vperm.xlu0 %2124, %v1159_v13  }
 0x1ee   : > { %1168 = vperm.xlu1 %2285, %v1160_v14  }
 0x1f1   : > { %1030 = vperm.xlu0 %2124, %v1026_v15  }
 0x1f2   : > { %1035 = vperm.xlu1 %2285, %v1027_v18  }
 0x23f   : > { %v2207_v25 = vpop.permute.xlu0 %2206 }
 0x240   : > { %v2209_v35 = vunpack.i.h.bf16 %v2207_v25  ;;  %v2208_v36 = vunpack.i.l.bf16 %v2207_v25  ;;  %v2227_v27 = vpop.permute.xlu1 %2226 }
 0x241   : > { %v2229_v28 = vunpack.i.h.bf16 %v2227_v27  ;;  %v2228_v29 = vunpack.i.l.bf16 %v2227_v27 }
 0x243   : > { %v867_v31 = vsel %vm3371_vm5, %v2209_v35, %v2229_v28  ;;  %v869_v22 = vsel %vm3371_vm5, %v2229_v28, %v2209_v35  ;;  %v866_v32 = vsel %vm3371_vm5, %v2208_v36, %v2228_v29  ;;  %v868_v39 = vsel %vm3371_vm5, %v2228_v29, %v2208_v36  ;;  %v2212_v34 = vpop.permute.xlu0 %2211  ;;  %vm3403_vm5 = vmmov %vm3401_vm4 }
 0x244   : > { %v1906_v41 = vpack.c.bf16 %v867_v31, %v866_v32  ;;  %v1909_v43 = vpack.c.bf16 %v869_v22, %v868_v39  ;;  %v2214_v44 = vunpack.i.h.bf16 %v2212_v34  ;;  %v2213_v45 = vunpack.i.l.bf16 %v2212_v34  ;;  %v2232_v48 = vpop.permute.xlu1 %2231 }
 0x245   : > { %v2234_v49 = vunpack.i.h.bf16 %v2232_v48  ;;  %v2233_v50 = vunpack.i.l.bf16 %v2232_v48 }
 0x246   : > { %1907 = vmatprep.subr.msk.bf16.mxu0 %vm2712_vm12, %v1906_v41 }
 0x247   : > { %v885_v51 = vsel %vm747_vm8, %v2234_v49, %v2214_v44  ;;  %v884_v52 = vsel %vm747_vm8, %v2233_v50, %v2213_v45  ;;  %v2217_v53 = vpop.permute.xlu0 %2216  ;;  %1910 = vmatpush1.bf16.msk.msra.mxu0 %vm2705_vm11, %v1909_v43  ;;  %v882_v54 = vsel %vm747_vm8, %v2213_v45, %v2233_v50  ;;  %v883_v55 = vsel %vm747_vm8, %v2214_v44, %v2234_v49 }
 0x248   : > { %v1912_v57 = vpack.c.bf16 %v885_v51, %v884_v52  ;;  %v2219_v58 = vunpack.i.h.bf16 %v2217_v53  ;;  %v2218_v59 = vunpack.i.l.bf16 %v2217_v53  ;;  %v2237_v60 = vpop.permute.xlu1 %2236  ;;  %v1011_v61 = vpack.c.bf16 %v883_v55, %v882_v54 }
 0x249   : > { %v2239_v5 = vunpack.i.h.bf16 %v2237_v60  ;;  %v2238_v6 = vunpack.i.l.bf16 %v2237_v60 }
 0x24a   : > { %1077 = vmatprep.subr.bf16.mxu0 %v1011_v61 }
 0x24b   : > { %v899_v10 = vsel %vm3400_vm14, %v2219_v58, %v2239_v5  ;;  %v901_v12 = vsel %vm3401_vm4, %v2239_v5, %v2219_v58  ;;  %v898_v13 = vsel %vm3402_vm7, %v2218_v59, %v2238_v6  ;;  %v900_v14 = vsel %vm3403_vm5, %v2238_v6, %v2218_v59  ;;  %v2222_v15 = vpop.permute.xlu0 %2221  ;;  %1913 = vmatpush1.bf16.msk.msra.mxu0 %vm2740_vm0, %v1912_v57 }
 0x24c   : > { %v1915_v16 = vpack.c.bf16 %v899_v10, %v898_v13  ;;  %v1918_v17 = vpack.c.bf16 %v901_v12, %v900_v14  ;;  %v2224_v18 = vunpack.i.h.bf16 %v2222_v15  ;;  %v2223_v37 = vunpack.i.l.bf16 %v2222_v15  ;;  %v2242_v38 = vpop.permute.xlu1 %2241 }
 0x24d   : > { %v2244_v19 = vunpack.i.h.bf16 %v2242_v38  ;;  %v2243_v21 = vunpack.i.l.bf16 %v2242_v38  ;;  %vm3404_vm14 = vcmp.lt.s32.totalorder %v2675_v63, 1 }
 0x24e   : > { %1916 = vmatprep.subr.msk.bf16.mxu0 %vm2747_vm1, %v1915_v16  ;;  %vm3405_vm4 = vmmov %vm3404_vm14 }
 0x24f   : > { %v915_v24 = vsel %vm3404_vm14, %v2224_v18, %v2244_v19  ;;  %v917_v25 = vsel %vm3405_vm4, %v2244_v19, %v2224_v18  ;;  %vm3406_vm5 = vmmov %vm3405_vm4  ;;  %v2247_v27 = vpop.permute.xlu0 %2246  ;;  %1919 = vmatpush1.bf16.msk.msra.mxu0 %vm2768_vm9, %v1918_v17  ;;  %vm3408_vm14 = vcmp.lt.s32.totalorder %v2675_v63, 127  ;;  %v2448_v19 = vld [vmem:[%s3351_s9] ss:$12 sps:$4 sm:$0xff]  }
 0x250   : > { %v914_v35 = vsel %vm3406_vm5, %v2223_v37, %v2243_v21  ;;  %vm3407_vm7 = vmmov %vm3405_vm4  ;;  %v2249_v31 = vunpack.i.h.bf16 %v2247_v27  ;;  %v2248_v22 = vunpack.i.l.bf16 %v2247_v27  ;;  %v2257_v32 = vpop.permute.xlu1 %2256 }
 0x251   : > { %v916_v36 = vsel %vm3407_vm7, %v2243_v21, %v2223_v37  ;;  %v1921_v28 = vpack.c.bf16 %v915_v24, %v914_v35  ;;  %v2259_v39 = vunpack.i.h.bf16 %v2257_v32  ;;  %v2258_v34 = vunpack.i.l.bf16 %v2257_v32  ;;  %vm3409_vm4 = vmmov %vm3408_vm14 }
 0x252   : > { %v1924_v29 = vpack.c.bf16 %v917_v25, %v916_v36  ;;  %vm3410_vm5 = vmmov %vm3409_vm4 }
 0x253   : > { %1922 = vmatprep.subr.msk.bf16.mxu0 %vm2712_vm12, %v1921_v28  ;;  %v933_v41 = vsel %vm3408_vm14, %v2259_v39, %v2249_v31  ;;  %v932_v43 = vsel %vm3409_vm4, %v2258_v34, %v2248_v22  ;;  %v2252_v44 = vpop.permute.xlu0 %2251  ;;  %v931_v52 = vsel %vm3410_vm5, %v2249_v31, %v2259_v39  ;;  %vm3411_vm7 = vmmov %vm3409_vm4  ;;  %vm3412_vm14 = vcmp.lt.s32.totalorder %v2675_v63, 113 }
 0x254   : > { %1925 = vmatpush1.bf16.msk.msra.mxu0 %vm2786_vm2, %v1924_v29  ;;  %v2254_v45 = vunpack.i.h.bf16 %v2252_v44  ;;  %v2253_v48 = vunpack.i.l.bf16 %v2252_v44  ;;  %v2262_v49 = vpop.permute.xlu1 %2261  ;;  %v930_v53 = vsel %vm3411_vm7, %v2248_v22, %v2258_v34  ;;  %v1927_v54 = vpack.c.bf16 %v933_v41, %v932_v43  ;;  %vm3413_vm4 = vmmov %vm3412_vm14  ;;  %v2451_v29 = vld [vmem:[%s3351_s9 + $0x8] ss:$12 sps:$4 sm:$0xff]  }
 0x255   : > { %1083 = vmatprep.subr.bf16.mxu0 %v1017_v7  ;;  %v2264_v50 = vunpack.i.h.bf16 %v2262_v49  ;;  %v2263_v51 = vunpack.i.l.bf16 %v2262_v49  ;;  %v1930_v59 = vpack.c.bf16 %v931_v52, %v930_v53  ;;  %vm3414_vm5 = vmmov %vm3413_vm4 }
 0x256   : > { %vm3415_vm7 = vmmov %vm3413_vm4 }
 0x257   : > { %v949_v55 = vsel %vm3412_vm14, %v2264_v50, %v2254_v45  ;;  %v948_v57 = vsel %vm3413_vm4, %v2263_v51, %v2253_v48  ;;  %v2267_v58 = vpop.permute.xlu0 %2266  ;;  %v947_v5 = vsel %vm3414_vm5, %v2254_v45, %v2264_v50  ;;  %v946_v6 = vsel %vm3415_vm7, %v2253_v48, %v2263_v51 }
 0x258   : > { %1084 = vmatpush1.bf16.msra.mxu0 %v1016_v8  ;;  %v2269_v3 = vunpack.i.h.bf16 %v2267_v58  ;;  %v2268_v33 = vunpack.i.l.bf16 %v2267_v58  ;;  %v2277_v7 = vpop.permute.xlu1 %2276  ;;  %v1933_v10 = vpack.c.bf16 %v949_v55, %v948_v57  ;;  %vm3416_vm14 = vcmp.lt.s32.totalorder %v2675_v63, 112 }
 0x259   : > { %1928 = vmatprep.subr.msk.bf16.mxu0 %vm2747_vm1, %v1927_v54  ;;  %v2279_v60 = vunpack.i.h.bf16 %v2277_v7  ;;  %v2278_v61 = vunpack.i.l.bf16 %v2277_v7  ;;  %vm3417_vm4 = vmmov %vm3416_vm14  ;;  %v1936_v15 = vpack.c.bf16 %v947_v5, %v946_v6 }
 0x25a   : > { %vm3418_vm5 = vmmov %vm3417_vm4 }
 0x25b   : > { %v965_v1 = vsel %vm3416_vm14, %v2279_v60, %v2269_v3  ;;  %v964_v4 = vsel %vm3417_vm4, %v2278_v61, %v2268_v33  ;;  %v2272_v8 = vpop.permute.xlu0 %2271  ;;  %v963_v18 = vsel %vm3418_vm5, %v2269_v3, %v2279_v60  ;;  %vm3419_vm7 = vmmov %vm3417_vm4  ;;  %vm3420_vm14 = vcmask 261120  }
 0x25c   : > { %1931 = vmatpush1.bf16.msk.msra.mxu0 %vm2820_vm6, %v1930_v59  ;;  %v2274_v12 = vunpack.i.h.bf16 %v2272_v8  ;;  %v2273_v13 = vunpack.i.l.bf16 %v2272_v8  ;;  %v2282_v14 = vpop.permute.xlu1 %2281  ;;  %v962_v37 = vsel %vm3419_vm7, %v2268_v33, %v2278_v61  ;;  %v1939_v38 = vpack.c.bf16 %v965_v1, %v964_v4  ;;  %v2454_v4 = vld [vmem:[%s3353_s11 + $0x4] ss:$12 sps:$4 sm:$0xff]  }
 0x25d   : > { %1934 = vmatprep.subr.msk.bf16.mxu0 %vm2834_vm10, %v1933_v10  ;;  %v2284_v16 = vunpack.i.h.bf16 %v2282_v14  ;;  %v2283_v17 = vunpack.i.l.bf16 %v2282_v14  ;;  %v1022_v25 = vpack.c.bf16 %v963_v18, %v962_v37  ;;  %vm1226_vm4 = vcmask 130048   ;;  %v1606_v8 = vld [vmem:[%s3354_s12] sm:$0xff] }
 0x25e   : > { %vm3425_vm5 = vcmp.lt.s32.totalorder %v2675_v63, 17 }
 0x25f   : > { %v981_v21 = vsel %vm849_vm15, %v2284_v16, %v2274_v12  ;;  %v980_v24 = vsel %vm849_vm15, %v2283_v17, %v2273_v13  ;;  %v979_v35 = vsel %vm849_vm15, %v2274_v12, %v2284_v16  ;;  %v978_v36 = vsel %vm849_vm15, %v2273_v13, %v2283_v17  ;;  %v1607_v12 = vld [vmem:[%s3354_s12 + $0x8] sm:$0xff]  ;;  %vm3426_vm7 = vmmov %vm3425_vm5 }
 0x260   : > { %1937 = vmatpush1.bf16.msk.msra.mxu0 %vm2786_vm2, %v1936_v15  ;;  %v1942_v27 = vpack.c.bf16 %v981_v21, %v980_v24  ;;  %v1945_v28 = vpack.c.bf16 %v979_v35, %v978_v36 }
 0x261   : > { %1940 = vmatprep.subr.msk.bf16.mxu0 %vm2849_vm13, %v1939_v38 }
 0x263   : > { %1090 = vmatmul.mubr.bf16.vlgmr.msra.gmra.mrb[8].mxu0 %v2448_v19 }
 0x264   : > { %1101 = vmatpush1.bf16.msra.mxu0 %v1022_v25  ;;  %1132 = vmatprep.mubr.bf16.mxu0 %v2466_v2 }
 0x265   : > { %1943 = vmatprep.subr.msk.bf16.mxu0 %vm2870_vm3, %v1942_v27 }
 0x268   : > { %1946 = vmatpush1.bf16.msk.msra.mxu0 %vm2820_vm6, %v1945_v28 }
 0x26c   : > { %v1164_v31 = vpop.permute.xlu0 %1163 }
 0x26d   : > { %v1214_v22 = vadd.f32 %v2911_v11, %v1164_v31  ;;  %v1169_v32 = vpop.permute.xlu1 %1168 }
 0x26e   : > { %v1217_v39 = vadd.f32 %v2939_v20, %v1169_v32 }
 0x26f   : > { %1947 = vmatmul.mubr.msk.bf16.vlgmr.msra.gmra.mrb[8].mxu0 %vm3420_vm14, %v2451_v29  ;;  %v1220_v34 = vmax.f32 %v1214_v22, 0.0  ;;  %vm3427_vm14 = vmmov %vm3425_vm5 }
 0x270   : > { %v1221_v41 = vmax.f32 %v1217_v39, 0.0  ;;  %v1031_v43 = vpop.permute.xlu0 %1030 }
 0x271   : > { %1950 = vmatmul.mubr.msk.f32.vlgmr.msra.gmra.mrb[4].mxu1 %vm1226_vm4, %v1220_v34  ;;  %v1036_v11 = vpop.permute.xlu1 %1035 }
 0x272   : > { %1303 = vmatprep.mubr.f32.mxu1 %v2464_v0 }
 0x275   : > { %1951 = vmatmul.mubr.msk.f32.gmra.mrb[6].mxu1 %vm1226_vm4, %v1221_v41  ;;  %vm3428_vm4 = vmmov %vm3425_vm5 }
 0x276   : > { %1668 = vmatprep.mubr.bf16.mxu1 %v2454_v4 }
 0x342   : > { %v1134_v44 = vpop.f32.mrb[8].mxu0 }
 0x343   : > { %v2088_v45 = vadd.f32 %v1134_v44, %v1031_v43  ;;  %v1136_v48 = vpop.f32.mrb[9].mxu0 }
 0x344   : > { %v2089_v49 = vadd.f32 %v1136_v48, %v1031_v43  ;;  %v1138_v50 = vpop.f32.mrb[10].mxu0  ;;  %v3056_v53 = vpop.f32.mrb[4].mxu1 }
 0x345   : > { %v3054_v51 = vmax.f32 %v2088_v45, 0.0  ;;  %v2090_v20 = vadd.f32 %v1138_v50, %v1036_v11  ;;  %v1140_v52 = vpop.f32.mrb[11].mxu0  ;;  %v3060_v55 = vpop.f32.mrb[5].mxu1 }
 0x346   : > { %v3058_v54 = vmax.f32 %v2089_v49, 0.0  ;;  %v2091_v0 = vadd.f32 %v1140_v52, %v1036_v11 }
 0x347   : > { %1147 = vst [vmem:[%s515_s24] sm:$0xff] %v3054_v51  ;;  %v3063_v57 = vmax.f32 %v2090_v20, 0.0 }
 0x348   : > { %1148 = vst [vmem:[%s515_s24 + $0x8] sm:$0xff] %v3058_v54  ;;  %v3066_v58 = vmax.f32 %v2091_v0, 0.0  ;;  %v3069_v3 = vpop.f32.mrb[6].mxu1 }
 0x349   : > { %1149 = vst [vmem:[%s515_s24 + $0x10] sm:$0xff] %v3063_v57  ;;  %v2286_v33 = vpack.i.bf16 %v3063_v57, %v3054_v51  ;;  %v3074_v7 = vpop.f32.mrb[7].mxu1  ;;  %v2346_v60 = vpack.i.bf16 %v3069_v3, %v3056_v53  ;;  %v1578_v6 = vpack.c.bf16 %v3063_v57, %v3054_v51  ;;  %v1596_v1 = vpack.c.bf16 %v3069_v3, %v3056_v53 }
 0x34a   : > { %1150 = vst [vmem:[%s515_s24 + $0x18] sm:$0xff] %v3066_v58  ;;  %v2306_v59 = vpack.i.bf16 %v3066_v58, %v3058_v54  ;;  %v2371_v61 = vpack.i.bf16 %v3074_v7, %v3060_v55  ;;  %v1579_v5 = vpack.c.bf16 %v3066_v58, %v3058_v54  ;;  %v1597_v10 = vpack.c.bf16 %v3074_v7, %v3060_v55 }
 0x34b   : > { %2287 = vrot.lane.b32.xlu0 %v2286_v33, %s2467_s21 }
 0x34c   : > { %2307 = vrot.lane.b32.xlu1 %v2306_v59, %s2467_s21 }
 0x34f   : > { %2292 = vrot.lane.b32.xlu0 %v2286_v33, %s2468_s22 }
 0x350   : > { %2312 = vrot.lane.b32.xlu1 %v2306_v59, %s2468_s22 }
 0x353   : > { %2297 = vrot.lane.b32.xlu0 %v2286_v33, %s2469_s23 }
 0x354   : > { %2317 = vrot.lane.b32.xlu1 %v2306_v59, %s2469_s23 }
 0x357   : > { %2302 = vrot.lane.b32.xlu0 %v2286_v33, %s2470_s26 }
 0x358   : > { %2322 = vrot.lane.b32.xlu1 %v2306_v59, %s2470_s26 }
 0x35b   : > { %2327 = vrot.lane.b32.xlu0 %v2286_v33, %s3421_s25 }
 0x35c   : > { %2352 = vrot.lane.b32.xlu1 %v2306_v59, %s3421_s25 }
 0x35f   : > { %2332 = vrot.lane.b32.xlu0 %v2286_v33, %s3422_s18 }
 0x360   : > { %2357 = vrot.lane.b32.xlu1 %v2306_v59, %s3422_s18 }
 0x363   : > { %2337 = vrot.lane.b32.xlu0 %v2286_v33, %s3423_s19 }
 0x364   : > { %2362 = vrot.lane.b32.xlu1 %v2306_v59, %s3423_s19 }
 0x367   : > { %2342 = vrot.lane.b32.xlu0 %v2286_v33, %s3424_s27 }
 0x368   : > { %2367 = vrot.lane.b32.xlu1 %v2306_v59, %s3424_s27 }
 0x36b   : > { %2347 = vrot.lane.b32.xlu0 %v2346_v60, %s2467_s21 }
 0x36c   : > { %2372 = vrot.lane.b32.xlu1 %v2371_v61, %s2467_s21 }
 0x36f   : > { %2377 = vrot.lane.b32.xlu0 %v2346_v60, %s2468_s22 }
 0x370   : > { %2382 = vrot.lane.b32.xlu1 %v2371_v61, %s2468_s22 }
 0x373   : > { %2387 = vrot.lane.b32.xlu0 %v2346_v60, %s2469_s23 }
 0x374   : > { %2392 = vrot.lane.b32.xlu1 %v2371_v61, %s2469_s23 }
 0x377   : > { %2397 = vrot.lane.b32.xlu0 %v2346_v60, %s2470_s26 }
 0x378   : > { %2402 = vrot.lane.b32.xlu1 %v2371_v61, %s2470_s26 }
 0x37b   : > { %2407 = vrot.lane.b32.xlu0 %v2346_v60, %s3421_s25 }
 0x37c   : > { %2412 = vrot.lane.b32.xlu1 %v2371_v61, %s3421_s25 }
 0x37f   : > { %2417 = vrot.lane.b32.xlu0 %v2346_v60, %s3422_s18 }
 0x380   : > { %2422 = vrot.lane.b32.xlu1 %v2371_v61, %s3422_s18 }
 0x383   : > { %2427 = vrot.lane.b32.xlu0 %v2346_v60, %s3423_s19 }
 0x384   : > { %2432 = vrot.lane.b32.xlu1 %v2371_v61, %s3423_s19  ;;  %s520_s19 = scalar_lea.vmem %s3356_s14, %s2630_s15 }
 0x387   : > { %2437 = vrot.lane.b32.xlu0 %v2346_v60, %s3424_s27 }
 0x388   : > { %2442 = vrot.lane.b32.xlu1 %v2371_v61, %s3424_s27 }
 0x38b   : > { %1610 = vperm.xlu0 %2124, %v1606_v8  }
 0x38c   : > { %1615 = vperm.xlu1 %2285, %v1607_v12  }
 0x3bd   : > { %v2288_v13 = vpop.permute.xlu0 %2287 }
 0x3be   : > { %v2290_v14 = vunpack.i.h.bf16 %v2288_v13  ;;  %v2289_v15 = vunpack.i.l.bf16 %v2288_v13  ;;  %v2308_v16 = vpop.permute.xlu1 %2307 }
 0x3bf   : > { %v2310_v17 = vunpack.i.h.bf16 %v2308_v16  ;;  %v2309_v18 = vunpack.i.l.bf16 %v2308_v16 }
 0x3c1   : > { %v1318_v37 = vsel %vm3425_vm5, %v2289_v15, %v2309_v18  ;;  %v1319_v38 = vsel %vm3426_vm7, %v2290_v14, %v2310_v17  ;;  %v1320_v19 = vsel %vm3427_vm14, %v2309_v18, %v2289_v15  ;;  %v1321_v21 = vsel %vm3428_vm4, %v2310_v17, %v2290_v14  ;;  %v2293_v24 = vpop.permute.xlu0 %2292 }
 0x3c2   : > { %v1956_v25 = vpack.c.bf16 %v1319_v38, %v1318_v37  ;;  %v1959_v35 = vpack.c.bf16 %v1321_v21, %v1320_v19  ;;  %v2295_v36 = vunpack.i.h.bf16 %v2293_v24  ;;  %v2294_v27 = vunpack.i.l.bf16 %v2293_v24  ;;  %v2313_v28 = vpop.permute.xlu1 %2312 }
 0x3c3   : > { %v2315_v29 = vunpack.i.h.bf16 %v2313_v28  ;;  %v2314_v31 = vunpack.i.l.bf16 %v2313_v28  ;;  %vm3429_vm5 = vcmp.lt.s32.totalorder %v2675_v63, 15 }
 0x3c4   : > { %1957 = vmatprep.subr.msk.bf16.mxu1 %vm2712_vm12, %v1956_v25  ;;  %vm3430_vm7 = vmmov %vm3429_vm5 }
 0x3c5   : > { %v1336_v22 = vsel %vm747_vm8, %v2314_v31, %v2294_v27  ;;  %v1337_v32 = vsel %vm747_vm8, %v2315_v29, %v2295_v36  ;;  %v2298_v39 = vpop.permute.xlu0 %2297  ;;  %1960 = vmatpush1.bf16.msk.msra.mxu1 %vm2705_vm11, %v1959_v35  ;;  %v1334_v34 = vsel %vm747_vm8, %v2294_v27, %v2314_v31  ;;  %v1335_v41 = vsel %vm747_vm8, %v2295_v36, %v2315_v29  ;;  %vm3431_vm14 = vmmov %vm3429_vm5 }
 0x3c6   : > { %v1962_v43 = vpack.c.bf16 %v1337_v32, %v1336_v22  ;;  %v2300_v44 = vunpack.i.h.bf16 %v2298_v39  ;;  %v2299_v45 = vunpack.i.l.bf16 %v2298_v39  ;;  %v2318_v48 = vpop.permute.xlu1 %2317  ;;  %v1573_v11 = vpack.c.bf16 %v1335_v41, %v1334_v34  ;;  %vm3432_vm4 = vmmov %vm3429_vm5 }
 0x3c7   : > { %v2320_v49 = vunpack.i.h.bf16 %v2318_v48  ;;  %v2319_v50 = vunpack.i.l.bf16 %v2318_v48 }
 0x3c8   : > { %1638 = vmatprep.subr.bf16.mxu1 %v1573_v11 }
 0x3c9   : > { %v1350_v20 = vsel %vm3429_vm5, %v2299_v45, %v2319_v50  ;;  %v1351_v52 = vsel %vm3430_vm7, %v2300_v44, %v2320_v49  ;;  %v1352_v0 = vsel %vm3431_vm14, %v2319_v50, %v2299_v45  ;;  %v1353_v33 = vsel %vm3432_vm4, %v2320_v49, %v2300_v44  ;;  %v2303_v59 = vpop.permute.xlu0 %2302  ;;  %1963 = vmatpush1.bf16.msk.msra.mxu1 %vm2740_vm0, %v1962_v43 }
 0x3ca   : > { %v1965_v60 = vpack.c.bf16 %v1351_v52, %v1350_v20  ;;  %v1968_v61 = vpack.c.bf16 %v1353_v33, %v1352_v0  ;;  %v2305_v4 = vunpack.i.h.bf16 %v2303_v59  ;;  %v2304_v8 = vunpack.i.l.bf16 %v2303_v59  ;;  %v2323_v12 = vpop.permute.xlu1 %2322 }
 0x3cb   : > { %v2325_v13 = vunpack.i.h.bf16 %v2323_v12  ;;  %v2324_v14 = vunpack.i.l.bf16 %v2323_v12  ;;  %vm3433_vm5 = vcmp.lt.s32.totalorder %v2675_v63, 1 }
 0x3cc   : > { %1966 = vmatprep.subr.msk.bf16.mxu1 %vm2747_vm1, %v1965_v60  ;;  %vm3434_vm7 = vmmov %vm3433_vm5 }
 0x3cd   : > { %v1366_v15 = vsel %vm3433_vm5, %v2304_v8, %v2324_v14  ;;  %v1367_v16 = vsel %vm3434_vm7, %v2305_v4, %v2325_v13  ;;  %vm3435_vm14 = vmmov %vm3433_vm5  ;;  %v2328_v37 = vpop.permute.xlu0 %2327  ;;  %1969 = vmatpush1.bf16.msk.msra.mxu1 %vm2768_vm9, %v1968_v61 }
 0x3ce   : > { %v1368_v17 = vsel %vm3435_vm14, %v2324_v14, %v2304_v8  ;;  %vm3436_vm4 = vmmov %vm3433_vm5  ;;  %v1971_v38 = vpack.c.bf16 %v1367_v16, %v1366_v15  ;;  %v2330_v21 = vunpack.i.h.bf16 %v2328_v37  ;;  %v2329_v24 = vunpack.i.l.bf16 %v2328_v37  ;;  %v2353_v25 = vpop.permute.xlu1 %2352 }
 0x3cf   : > { %v1369_v18 = vsel %vm3436_vm4, %v2325_v13, %v2305_v4  ;;  %v2355_v35 = vunpack.i.h.bf16 %v2353_v25  ;;  %v2354_v36 = vunpack.i.l.bf16 %v2353_v25  ;;  %vm3437_vm5 = vcmp.lt.s32.totalorder %v2675_v63, 127 }
 0x3d0   : > { %v1974_v19 = vpack.c.bf16 %v1369_v18, %v1368_v17  ;;  %1972 = vmatprep.subr.msk.bf16.mxu1 %vm2712_vm12, %v1971_v38  ;;  %vm3438_vm7 = vmmov %vm3437_vm5 }
 0x3d1   : > { %v1384_v27 = vsel %vm3437_vm5, %v2354_v36, %v2329_v24  ;;  %v1385_v28 = vsel %vm3438_vm7, %v2355_v35, %v2330_v21  ;;  %v2333_v29 = vpop.permute.xlu0 %2332  ;;  %vm3439_vm14 = vmmov %vm3437_vm5 }
 0x3d2   : > { %1975 = vmatpush1.bf16.msk.msra.mxu1 %vm2786_vm2, %v1974_v19  ;;  %v2335_v31 = vunpack.i.h.bf16 %v2333_v29  ;;  %v2334_v22 = vunpack.i.l.bf16 %v2333_v29  ;;  %v2358_v32 = vpop.permute.xlu1 %2357  ;;  %v1382_v41 = vsel %vm3439_vm14, %v2329_v24, %v2354_v36  ;;  %vm3440_vm4 = vmmov %vm3437_vm5  ;;  %v1977_v44 = vpack.c.bf16 %v1385_v28, %v1384_v27 }
 0x3d3   : > { %1644 = vmatprep.subr.bf16.mxu1 %v1579_v5  ;;  %v2360_v39 = vunpack.i.h.bf16 %v2358_v32  ;;  %v2359_v34 = vunpack.i.l.bf16 %v2358_v32  ;;  %v1383_v43 = vsel %vm3440_vm4, %v2330_v21, %v2355_v35  ;;  %vm3441_vm5 = vcmp.lt.s32.totalorder %v2675_v63, 113 }
 0x3d4   : > { %vm3442_vm7 = vmmov %vm3441_vm5  ;;  %v1980_v49 = vpack.c.bf16 %v1383_v43, %v1382_v41 }
 0x3d5   : > { %v1400_v45 = vsel %vm3441_vm5, %v2359_v34, %v2334_v22  ;;  %v1401_v48 = vsel %vm3442_vm7, %v2360_v39, %v2335_v31  ;;  %v2338_v11 = vpop.permute.xlu0 %2337  ;;  %vm3443_vm14 = vmmov %vm3441_vm5 }
 0x3d6   : > { %1645 = vmatpush1.bf16.msra.mxu1 %v1578_v6  ;;  %v2340_v54 = vunpack.i.h.bf16 %v2338_v11  ;;  %v2339_v58 = vunpack.i.l.bf16 %v2338_v11  ;;  %v2363_v5 = vpop.permute.xlu1 %2362  ;;  %v1398_v52 = vsel %vm3443_vm14, %v2334_v22, %v2359_v34  ;;  %vm3444_vm4 = vmmov %vm3441_vm5  ;;  %v1983_v33 = vpack.c.bf16 %v1401_v48, %v1400_v45 }
 0x3d7   : > { %1978 = vmatprep.subr.msk.bf16.mxu1 %vm2747_vm1, %v1977_v44  ;;  %v2365_v50 = vunpack.i.h.bf16 %v2363_v5  ;;  %v2364_v20 = vunpack.i.l.bf16 %v2363_v5  ;;  %v1399_v0 = vsel %vm3444_vm4, %v2335_v31, %v2360_v39  ;;  %vm3445_vm5 = vcmp.lt.s32.totalorder %v2675_v63, 112 }
 0x3d8   : > { %vm3446_vm7 = vmmov %vm3445_vm5  ;;  %v1986_v4 = vpack.c.bf16 %v1399_v0, %v1398_v52 }
 0x3d9   : > { %v1416_v51 = vsel %vm3445_vm5, %v2364_v20, %v2339_v58  ;;  %v1417_v57 = vsel %vm3446_vm7, %v2365_v50, %v2340_v54  ;;  %v2343_v6 = vpop.permute.xlu0 %2342  ;;  %vm3447_vm14 = vmmov %vm3445_vm5 }
 0x3da   : > { %1981 = vmatpush1.bf16.msk.msra.mxu1 %vm2820_vm6, %v1980_v49  ;;  %v2345_v59 = vunpack.i.h.bf16 %v2343_v6  ;;  %v2344_v60 = vunpack.i.l.bf16 %v2343_v6  ;;  %v2368_v61 = vpop.permute.xlu1 %2367  ;;  %v1414_v13 = vsel %vm3447_vm14, %v2339_v58, %v2364_v20  ;;  %vm3448_vm4 = vmmov %vm3445_vm5  ;;  %v1989_v15 = vpack.c.bf16 %v1417_v57, %v1416_v51 }
 0x3db   : > { %1984 = vmatprep.subr.msk.bf16.mxu1 %vm2834_vm10, %v1983_v33  ;;  %v2370_v8 = vunpack.i.h.bf16 %v2368_v61  ;;  %v2369_v12 = vunpack.i.l.bf16 %v2368_v61  ;;  %v1415_v14 = vsel %vm3448_vm4, %v2340_v54, %v2365_v50  ;;  %vm3449_vm5 = vcmp.lt.s32.totalorder %v2675_v63, 17 }
 0x3dc   : > { %v1584_v21 = vpack.c.bf16 %v1415_v14, %v1414_v13  ;;  %vm3450_vm7 = vmmov %vm3449_vm5 }
 0x3dd   : > { %v1432_v16 = vsel %vm849_vm15, %v2369_v12, %v2344_v60  ;;  %v1433_v17 = vsel %vm849_vm15, %v2370_v8, %v2345_v59  ;;  %v2348_v18 = vpop.permute.xlu0 %2347  ;;  %v1430_v35 = vsel %vm849_vm15, %v2344_v60, %v2369_v12  ;;  %v1431_v36 = vsel %vm849_vm15, %v2345_v59, %v2370_v8  ;;  %vm3451_vm14 = vmmov %vm3449_vm5 }
 0x3de   : > { %1987 = vmatpush1.bf16.msk.msra.mxu1 %vm2786_vm2, %v1986_v4  ;;  %v2350_v37 = vunpack.i.h.bf16 %v2348_v18  ;;  %v2349_v38 = vunpack.i.l.bf16 %v2348_v18  ;;  %v2373_v19 = vpop.permute.xlu1 %2372  ;;  %v1992_v27 = vpack.c.bf16 %v1433_v17, %v1432_v16  ;;  %v1995_v34 = vpack.c.bf16 %v1431_v36, %v1430_v35  ;;  %vm3452_vm4 = vmmov %vm3449_vm5 }
 0x3df   : > { %1990 = vmatprep.subr.msk.bf16.mxu1 %vm2849_vm13, %v1989_v15  ;;  %v2375_v24 = vunpack.i.h.bf16 %v2373_v19  ;;  %v2374_v25 = vunpack.i.l.bf16 %v2373_v19 }
 0x3e1   : > { %v1446_v28 = vsel %vm3449_vm5, %v2349_v38, %v2374_v25  ;;  %v1447_v29 = vsel %vm3450_vm7, %v2350_v37, %v2375_v24  ;;  %v2378_v31 = vpop.permute.xlu0 %2377  ;;  %v1448_v44 = vsel %vm3451_vm14, %v2374_v25, %v2349_v38  ;;  %v1449_v45 = vsel %vm3452_vm4, %v2375_v24, %v2350_v37 }
 0x3e2   : > { %1651 = vmatpush1.bf16.msra.mxu1 %v1584_v21  ;;  %v2380_v22 = vunpack.i.h.bf16 %v2378_v31  ;;  %v2379_v32 = vunpack.i.l.bf16 %v2378_v31  ;;  %v2383_v39 = vpop.permute.xlu1 %2382  ;;  %v1998_v48 = vpack.c.bf16 %v1447_v29, %v1446_v28  ;;  %v2001_v20 = vpack.c.bf16 %v1449_v45, %v1448_v44 }
 0x3e3   : > { %1993 = vmatprep.subr.msk.bf16.mxu1 %vm2870_vm3, %v1992_v27  ;;  %v2385_v41 = vunpack.i.h.bf16 %v2383_v39  ;;  %v2384_v43 = vunpack.i.l.bf16 %v2383_v39  ;;  %vm3453_vm5 = vcmp.lt.s32.totalorder %v2675_v63, 15  ;;  %vm3457_vm4 = vcmp.lt.s32.totalorder %v2675_v63, 1 }
 0x3e4   : > { %vm3454_vm7 = vmmov %vm3453_vm5 }
 0x3e5   : > { %v2388_v11 = vpop.permute.xlu0 %2387  ;;  %v1462_v54 = vsel %vm747_vm8, %v2379_v32, %v2384_v43  ;;  %v1463_v58 = vsel %vm747_vm8, %v2380_v22, %v2385_v41  ;;  %v1464_v33 = vsel %vm747_vm8, %v2384_v43, %v2379_v32  ;;  %v1465_v51 = vsel %vm747_vm8, %v2385_v41, %v2380_v22  ;;  %vm3455_vm8 = vmmov %vm3453_vm5 }
 0x3e6   : > { %1996 = vmatpush1.bf16.msk.msra.mxu1 %vm2820_vm6, %v1995_v34  ;;  %v2390_v5 = vunpack.i.h.bf16 %v2388_v11  ;;  %v2389_v49 = vunpack.i.l.bf16 %v2388_v11  ;;  %v2393_v50 = vpop.permute.xlu1 %2392  ;;  %v1591_v57 = vpack.c.bf16 %v1463_v58, %v1462_v54  ;;  %v2004_v12 = vpack.c.bf16 %v1465_v51, %v1464_v33  ;;  %vm3456_vm14 = vmmov %vm3453_vm5 }
 0x3e7   : > { %1999 = vmatprep.subr.msk.bf16.mxu1 %vm2712_vm12, %v1998_v48  ;;  %v2395_v52 = vunpack.i.h.bf16 %v2393_v50  ;;  %v2394_v0 = vunpack.i.l.bf16 %v2393_v50 }
 0x3e9   : > { %v1478_v6 = vsel %vm3453_vm5, %v2389_v49, %v2394_v0  ;;  %v1479_v59 = vsel %vm3454_vm7, %v2390_v5, %v2395_v52  ;;  %v2398_v60 = vpop.permute.xlu0 %2397  ;;  %v1480_v15 = vsel %vm3455_vm8, %v2394_v0, %v2389_v49  ;;  %v1481_v16 = vsel %vm3456_vm14, %v2395_v52, %v2390_v5  ;;  %vm3458_vm5 = vmmov %vm3457_vm4 }
 0x3ea   : > { %2002 = vmatpush1.bf16.msk.msra.mxu1 %vm2705_vm11, %v2001_v20  ;;  %v2400_v61 = vunpack.i.h.bf16 %v2398_v60  ;;  %v2399_v4 = vunpack.i.l.bf16 %v2398_v60  ;;  %v2403_v8 = vpop.permute.xlu1 %2402  ;;  %v2007_v17 = vpack.c.bf16 %v1479_v59, %v1478_v6  ;;  %v2010_v19 = vpack.c.bf16 %v1481_v16, %v1480_v15  ;;  %vm3459_vm11 = vmmov %vm3457_vm4 }
 0x3eb   : > { %1656 = vmatprep.subr.bf16.mxu1 %v1591_v57  ;;  %v2405_v13 = vunpack.i.h.bf16 %v2403_v8  ;;  %v2404_v14 = vunpack.i.l.bf16 %v2403_v8  ;;  %vm3460_vm7 = vmmov %vm3457_vm4  ;;  %vm3465_vm14 = vcmp.lt.s32.totalorder %v2675_v63, 113 }
 0x3ed   : > { %v1494_v18 = vsel %vm3457_vm4, %v2399_v4, %v2404_v14  ;;  %v1495_v23 = vsel %vm3458_vm5, %v2400_v61, %v2405_v13  ;;  %v2408_v37 = vpop.permute.xlu0 %2407  ;;  %v1496_v21 = vsel %vm3459_vm11, %v2404_v14, %v2399_v4  ;;  %v1497_v24 = vsel %vm3460_vm7, %v2405_v13, %v2400_v61  ;;  %vm3466_vm4 = vmmov %vm3465_vm14  ;;  %v2452_v61 = vld [vmem:[%s3353_s11] ss:$12 sps:$4 sm:$0xff]  }
 0x3ee   : > { %2005 = vmatpush1.bf16.msk.msra.mxu1 %vm2740_vm0, %v2004_v12  ;;  %v2413_v38 = vpop.permute.xlu1 %2412  ;;  %v2013_v25 = vpack.c.bf16 %v1495_v23, %v1494_v18  ;;  %v2410_v35 = vunpack.i.h.bf16 %v2408_v37  ;;  %v2409_v36 = vunpack.i.l.bf16 %v2408_v37  ;;  %v2016_v31 = vpack.c.bf16 %v1497_v24, %v1496_v21  ;;  %vm3467_vm5 = vmmov %vm3466_vm4 }
 0x3ef   : > { %2008 = vmatprep.subr.msk.bf16.mxu1 %vm2747_vm1, %v2007_v17  ;;  %v2415_v27 = vunpack.i.h.bf16 %v2413_v38  ;;  %v2414_v28 = vunpack.i.l.bf16 %v2413_v38  ;;  %vm3461_vm0 = vcmp.lt.s32.totalorder %v2675_v63, 127  ;;  %vm3468_vm11 = vmmov %vm3466_vm4  ;;  %vm3469_vm7 = vcmp.lt.s32.totalorder %v2675_v63, 112 }
 0x3f0   : > { %vm3462_vm8 = vmmov %vm3461_vm0 }
 0x3f1   : > { %v2418_v29 = vpop.permute.xlu0 %2417  ;;  %v1512_v22 = vsel %vm3461_vm0, %v2414_v28, %v2409_v36  ;;  %v1513_v32 = vsel %vm3462_vm8, %v2415_v27, %v2410_v35 }
 0x3f2   : > { %2011 = vmatpush1.bf16.msk.msra.mxu1 %vm2768_vm9, %v2010_v19  ;;  %v2423_v42 = vpop.permute.xlu1 %2422  ;;  %v2420_v39 = vunpack.i.h.bf16 %v2418_v29  ;;  %v2419_v34 = vunpack.i.l.bf16 %v2418_v29  ;;  %vm3464_vm9 = vmmov %vm3461_vm0  ;;  %v2019_v48 = vpack.c.bf16 %v1513_v32, %v1512_v22 }
 0x3f3   : > { %2014 = vmatprep.subr.msk.bf16.mxu1 %vm2712_vm12, %v2013_v25  ;;  %v2425_v41 = vunpack.i.h.bf16 %v2423_v42  ;;  %v2424_v43 = vunpack.i.l.bf16 %v2423_v42  ;;  %vm3463_vm12 = vmmov %vm3461_vm0  ;;  %v1511_v45 = vsel %vm3464_vm9, %v2410_v35, %v2415_v27 }
 0x3f4   : > { %v1510_v26 = vsel %vm3463_vm12, %v2409_v36, %v2414_v28  ;;  %vm3470_vm0 = vmmov %vm3469_vm7 }
 0x3f5   : > { %v2428_v44 = vpop.permute.xlu0 %2427  ;;  %v1528_v49 = vsel %vm3465_vm14, %v2424_v43, %v2419_v34  ;;  %v1529_v50 = vsel %vm3466_vm4, %v2425_v41, %v2420_v39  ;;  %v1526_v20 = vsel %vm3467_vm5, %v2419_v34, %v2424_v43  ;;  %v1527_v52 = vsel %vm3468_vm11, %v2420_v39, %v2425_v41  ;;  %vm3472_vm8 = vmmov %vm3470_vm0 }
 0x3f6   : > { %2017 = vmatpush1.bf16.msk.msra.mxu1 %vm2786_vm2, %v2016_v31  ;;  %v2433_v56 = vpop.permute.xlu1 %2432  ;;  %v2430_v11 = vunpack.i.h.bf16 %v2428_v44  ;;  %v2429_v54 = vunpack.i.l.bf16 %v2428_v44  ;;  %v2025_v0 = vpack.c.bf16 %v1529_v50, %v1528_v49  ;;  %v2028_v46 = vpack.c.bf16 %v1527_v52, %v1526_v20 }
 0x3f7   : > { %1662 = vmatprep.subr.bf16.mxu1 %v1597_v10  ;;  %v2435_v58 = vunpack.i.h.bf16 %v2433_v56  ;;  %v2434_v5 = vunpack.i.l.bf16 %v2433_v56  ;;  %v2022_v10 = vpack.c.bf16 %v1511_v45, %v1510_v26 }
 0x3f9   : > { %v2438_v55 = vpop.permute.xlu0 %2437  ;;  %v1544_v33 = vsel %vm3469_vm7, %v2434_v5, %v2429_v54  ;;  %v1545_v53 = vsel %vm3470_vm0, %v2435_v58, %v2430_v11  ;;  %v1543_v59 = vsel %vm3472_vm8, %v2430_v11, %v2435_v58 }
 0x3fa   : > { %1663 = vmatpush1.bf16.msra.mxu1 %v1596_v1  ;;  %v2443_v7 = vpop.permute.xlu1 %2442  ;;  %v2440_v3 = vunpack.i.h.bf16 %v2438_v55  ;;  %v2439_v1 = vunpack.i.l.bf16 %v2438_v55  ;;  %v2031_v60 = vpack.c.bf16 %v1545_v53, %v1544_v33 }
 0x3fb   : > { %2020 = vmatprep.subr.msk.bf16.mxu1 %vm2747_vm1, %v2019_v48  ;;  %v2445_v51 = vunpack.i.h.bf16 %v2443_v7  ;;  %v2444_v57 = vunpack.i.l.bf16 %v2443_v7  ;;  %vm3471_vm1 = vmmov %vm3470_vm0 }
 0x3fc   : > { %v1542_v6 = vsel %vm3471_vm1, %v2429_v54, %v2434_v5 }
 0x3fd   : > { %v1560_v4 = vsel %vm849_vm15, %v2444_v57, %v2439_v1  ;;  %v1561_v8 = vsel %vm849_vm15, %v2445_v51, %v2440_v3  ;;  %v1602_v40 = vpack.c.bf16 %v1543_v59, %v1542_v6  ;;  %v1558_v12 = vsel %vm849_vm15, %v2439_v1, %v2444_v57 }
 0x3fe   : > { %2023 = vmatpush1.bf16.msk.msra.mxu1 %vm2820_vm6, %v2022_v10  ;;  %v1559_v13 = vsel %vm849_vm15, %v2440_v3, %v2445_v51  ;;  %v2034_v14 = vpack.c.bf16 %v1561_v8, %v1560_v4 }
 0x3ff   : > { %2026 = vmatprep.subr.msk.bf16.mxu1 %vm2834_vm10, %v2025_v0  ;;  %v2037_v9 = vpack.c.bf16 %v1559_v13, %v1558_v12 }
 0x402   : > { %2029 = vmatpush1.bf16.msk.msra.mxu1 %vm2786_vm2, %v2028_v46  ;;  %vm3473_vm2 = vcmask 261120  }
 0x403   : > { %2032 = vmatprep.subr.msk.bf16.mxu1 %vm2849_vm13, %v2031_v60 }
 0x405   : > { %1669 = vmatmul.mubr.bf16.vlgmr.msra.gmra.mrb[8].mxu1 %v2452_v61 }
 0x406   : > { %1680 = vmatpush1.bf16.msra.mxu1 %v1602_v40  ;;  %1711 = vmatprep.mubr.bf16.mxu1 %v2466_v2 }
 0x407   : > { %2035 = vmatprep.subr.msk.bf16.mxu1 %vm2870_vm3, %v2034_v14 }
 0x40a   : > { %2038 = vmatpush1.bf16.msk.msra.mxu1 %vm2820_vm6, %v2037_v9  ;;  %v1611_v63 = vpop.permute.xlu0 %1610 }
 0x40b   : > { %v1616_v18 = vpop.permute.xlu1 %1615 }
 0x411   : > { %2039 = vmatmul.mubr.msk.bf16.vlgmr.msra.gmra.mrb[8].mxu1 %vm3473_vm2, %v2455_v47 }
 0x4e4   : > { %v1713_v15 = vpop.f32.mrb[8].mxu1 }
 0x4e5   : > { %v2092_v16 = vadd.f32 %v1713_v15, %v1611_v63  ;;  %v1715_v17 = vpop.f32.mrb[9].mxu1 }
 0x4e6   : > { %v2093_v2 = vadd.f32 %v1715_v17, %v1611_v63  ;;  %v1717_v62 = vpop.f32.mrb[10].mxu1 }
 0x4e7   : > { %v1722_v23 = vmax.f32 %v2092_v16, 0.0  ;;  %v2094_v30 = vadd.f32 %v1717_v62, %v1616_v18  ;;  %v1719_v37 = vpop.f32.mrb[11].mxu1 }
 0x4e8   : > { %v1723_v38 = vmax.f32 %v2093_v2, 0.0  ;;  %v2095_v19 = vadd.f32 %v1719_v37, %v1616_v18 }
 0x4e9   : > { %1726 = vst [vmem:[%s520_s19] sm:$0xff] %v1722_v23  ;;  %v1724_v21 = vmax.f32 %v2094_v30, 0.0 }
 0x4ea   : > { %1727 = vst [vmem:[%s520_s19 + $0x8] sm:$0xff] %v1723_v38  ;;  %v1725_v24 = vmax.f32 %v2095_v19, 0.0 }
 0x4eb   : > { %1728 = vst [vmem:[%s520_s19 + $0x10] sm:$0xff] %v1724_v21 }
 0x4ec   : > { %1729 = vst [vmem:[%s520_s19 + $0x18] sm:$0xff] %v1725_v24 }
 0x4ed PF: > { %s25_s29 = sadd.s32 1, %s2462_s29  }
 0x4ee   : > { %p22_p4 = scmp.ge.s32.totalorder %s25_s29, 4  }
 0x4f0   :  { %24 = sbr.rel (!%p22_p4) target bundleno = 1 (0x1), region = 120 }

</bundles_post_ra>
